<compile_context>
chip_gen: v7x
topology: tpu7x:2x2x1
jax: 0.10.0
libtpu: 0.0.40
codegen_flags: <defaults>
</compile_context>

<pallas_src>
import jax
import jax.numpy as jnp
from jax import lax
from jax.experimental import pallas as pl
from jax.experimental.pallas import tpu as pltpu


LANE = 128       # TPU lane width
SUBLANE = 8      # f32 sublane tile
NEG_INF = -1e30  # bias value for padded vocab lanes (vanishes in softmax)


def _round_up(x, m):
    return (x + m - 1) // m * m


# ----------------------------- Pallas kernels ------------------------------

def gru_decoder_kernel(x_ref, len_ref, h0_ref, wih_ref, whh_ref, bg_ref, bhn_ref,
                       out_ref, hfin_ref, gx_scr, out_scr):
    """Whole GRU recurrence for one batch tile in a single program.

    x_ref   : (1, T*B, E_pad) bf16  rows ordered (t, b) for this batch tile
    len_ref : (B, 1)          i32   per-row lengths
    h0_ref  : (B, H_pad)      f32   initial hidden
    wih_ref : (E_pad, 3*H_pad) bf16 gates in lane-aligned bands [r | z | n]
    whh_ref : (H_pad, 3*H_pad) bf16
    bg_ref  : (1, 3*H_pad)    f32   b_ih with b_hh folded into the r/z bands
    bhn_ref : (1, H_pad)      f32   b_hn kept separate (n gate)
    out_ref : (B, T, H_pad)   f32   batch-major rnn outputs (zeroed past length)
    hfin_ref: (B, H_pad)      f32   final hidden
    gx_scr  : (T*B, 3*H_pad)  f32   scratch: hoisted input-gate projections
    out_scr : (T*B, H_pad)    f32   scratch: time-major outputs (full-vreg stores)
    """
    B, HP = h0_ref.shape
    T = x_ref.shape[1] // B

    # ---- hoisted input projection: ONE (T*B, E) x (E, 3H) MXU matmul ------
    gx_scr[...] = jnp.dot(x_ref[0], wih_ref[...],
                          preferred_element_type=jnp.float32) + bg_ref[...]

    # Hoist loop-invariant loads / broadcasts out of the serial recurrence.
    w_hh = whh_ref[...]
    b_hn = jnp.broadcast_to(bhn_ref[...], (B, HP))
    lens = jnp.broadcast_to(len_ref[...], (B, HP))

    def step(t, h):
        row = pl.multiple_of(t * B, B)
        gx_t = gx_scr[pl.ds(row, B), :]                          # (B, 3*HP) f32
        gh = jnp.dot(h.astype(jnp.bfloat16), w_hh,
                     preferred_element_type=jnp.float32)          # (B, 3*HP) f32
        # Gates live in separate 128-lane bands -> aligned slices, no shuffles.
        r = jax.nn.sigmoid(gx_t[:, 0:HP] + gh[:, 0:HP])
        z = jax.nn.sigmoid(gx_t[:, HP:2 * HP] + gh[:, HP:2 * HP])
        n = jnp.tanh(gx_t[:, 2 * HP:] + r * (gh[:, 2 * HP:] + b_hn))
        h_new = (1.0 - z) * n + z * h
        mask = t < lens                                           # (B, HP) bool
        out_scr[pl.ds(row, B), :] = jnp.where(mask, h_new, 0.0)   # zero past length
        return jnp.where(mask, h_new, h)                          # freeze past length

    h_fin = lax.fori_loop(0, T, step, h0_ref[...], unroll=True)
    hfin_ref[...] = h_fin

    # One-time flush: time-major scratch -> batch-major output block, so no
    # host-side (T, B) transpose of any activation tensor is ever needed.
    for t in range(T):
        out_ref[:, t, :] = out_scr[t * B:(t + 1) * B, :]


def output_layer_kernel(x_ref, w_ref, b_ref, o_ref):
    """Linear(H_pad -> V_pad) + LogSoftmax for one lane-dense row tile."""
    logits = jnp.dot(x_ref[...].astype(jnp.bfloat16), w_ref[...],
                     preferred_element_type=jnp.float32) + b_ref[...]
    # Padded vocab lanes carry a -1e30 bias -> exp() underflows to 0, so the
    # softmax normalizer only sees real vocabulary entries.
    m = jnp.max(logits, axis=-1, keepdims=True)
    s = logits - m
    lse = jnp.log(jnp.sum(jnp.exp(s), axis=-1, keepdims=True))
    o_ref[...] = s - lse


# ------------------------------ JAX wrapper --------------------------------

def _pad_gates(w, in_pad, h, h_pad, dtype):
    """(in_dim, 3*h) -> (in_pad, 3*h_pad): each GRU gate in its own lane band."""
    in_dim = w.shape[0]
    out = jnp.zeros((in_pad, 3 * h_pad), dtype)
    for g in range(3):
        out = out.at[:in_dim, g * h_pad:g * h_pad + h].set(
            w[:, g * h:(g + 1) * h].astype(dtype))
    return out


def _pick_row_tile(rows, target=256):
    t = min(rows, target)
    while t > SUBLANE and (rows % t or t % SUBLANE):
        t -= SUBLANE
    return t


def rnn_decoder_forward(tokens, lengths, h0, params):
    """tokens: (B, T) int32, lengths: (B,) int32, h0: (1, B, H) f32.
    Returns (log_probs (B, T, V) f32, new_hidden (1, B, H) f32)."""
    emb = params["embedding"]
    B, T = tokens.shape
    E = emb.shape[1]
    H = h0.shape[-1]
    V = params["w_out"].shape[1]

    f32, bf16 = jnp.float32, jnp.bfloat16

    # Lane/sublane-aligned padded sizes.
    BP = _round_up(B, SUBLANE)
    EP = _round_up(E, LANE)
    HP = _round_up(H, LANE)
    VP = _round_up(V, LANE)
    B_TILE = SUBLANE                      # batch rows per GRU program
    nb = BP // B_TILE

    # ---- parameter repacking (would be done once at load time in practice) ----
    w_ih = _pad_gates(params["w_ih"], EP, H, HP, bf16)
    w_hh = _pad_gates(params["w_hh"], HP, H, HP, bf16)
    b_ih, b_hh = params["b_ih"], params["b_hh"]
    # Fold b_hh into b_ih for the r/z gates (one fewer VPU add per step);
    # the n gate keeps b_hn separate: n = tanh(gx_n + r*(gh_n + b_hn)).
    b_fold = jnp.concatenate([(b_ih + b_hh)[:, :2 * H], b_ih[:, 2 * H:]], axis=1)
    bg = _pad_gates(b_fold, 1, H, HP, f32)
    bhn = jnp.zeros((1, HP), f32).at[:, :H].set(b_hh[:, 2 * H:])
    w_out = jnp.zeros((HP, VP), bf16).at[:H, :V].set(params["w_out"].astype(bf16))
    b_out = jnp.full((1, VP), NEG_INF, f32).at[:, :V].set(params["b_out"])

    # ---- inputs: pad + embedding gather (plain-JAX glue) ----------------------
    emb_p = jnp.zeros((emb.shape[0], EP), bf16).at[:, :E].set(emb.astype(bf16))
    tok_p = jnp.zeros((BP, T), jnp.int32).at[:B].set(tokens)
    len_p = jnp.zeros((BP, 1), jnp.int32).at[:B, 0].set(lengths.astype(jnp.int32))
    h0_p = jnp.zeros((BP, HP), f32).at[:B, :H].set(h0[0].astype(f32))
    # Gather embeddings directly in the (batch-tile, time, row) layout the GRU
    # kernel wants, so no activation transpose / in-kernel reshape is needed.
    tok_idx = tok_p.reshape(nb, B_TILE, T).transpose(0, 2, 1).reshape(nb, T * B_TILE)
    x_tiles = jnp.take(emb_p, tok_idx, axis=0)          # (nb, T*B_TILE, EP) bf16

    vmem_limit = 48 * 1024 * 1024   # explicit; leaves headroom on v7x's 64 MiB VMEM

    rnn_out, h_fin = pl.pallas_call(
        gru_decoder_kernel,
        out_shape=(jax.ShapeDtypeStruct((BP, T, HP), f32),
                   jax.ShapeDtypeStruct((BP, HP), f32)),
        grid_spec=pltpu.PrefetchScalarGridSpec(
            num_scalar_prefetch=0,
            grid=(nb,),                                   # batch tiles
            in_specs=[
                pl.BlockSpec((1, T * B_TILE, EP), lambda b: (b, 0, 0)),   # x
                pl.BlockSpec((B_TILE, 1), lambda b: (b, 0)),              # lengths
                pl.BlockSpec((B_TILE, HP), lambda b: (b, 0)),             # h0
                pl.BlockSpec((EP, 3 * HP), lambda b: (0, 0)),             # W_ih^T
                pl.BlockSpec((HP, 3 * HP), lambda b: (0, 0)),             # W_hh^T
                pl.BlockSpec((1, 3 * HP), lambda b: (0, 0)),              # folded bias
                pl.BlockSpec((1, HP), lambda b: (0, 0)),                  # b_hn
            ],
            out_specs=[
                pl.BlockSpec((B_TILE, T, HP), lambda b: (b, 0, 0)),       # rnn out
                pl.BlockSpec((B_TILE, HP), lambda b: (b, 0)),             # final h
            ],
            scratch_shapes=[pltpu.VMEM((T * B_TILE, 3 * HP), f32),        # gx
                            pltpu.VMEM((T * B_TILE, HP), f32)],           # out slab
        ),
        compiler_params=pltpu.CompilerParams(
            dimension_semantics=("parallel",),            # megacore on v7x
            vmem_limit_bytes=vmem_limit),
    )(x_tiles, len_p, h0_p, w_ih, w_hh, bg, bhn)
    # TODO(synk): for very long T the (T, B_TILE, H_pad) resident slab should be
    # chunked over T to respect v7x's 64 MiB VMEM budget.

    # ---- output layer: row-tiled Linear + LogSoftmax ---------------------------
    rows = BP * T
    x2 = rnn_out.reshape(rows, HP)         # batch-major rows (b, t): free reshape
    row_tile = _pick_row_tile(rows)

    log_probs_p = pl.pallas_call(
        output_layer_kernel,
        out_shape=jax.ShapeDtypeStruct((rows, VP), f32),
        grid_spec=pltpu.PrefetchScalarGridSpec(
            num_scalar_prefetch=0,
            grid=(rows // row_tile,),
            in_specs=[
                pl.BlockSpec((row_tile, HP), lambda i: (i, 0)),
                pl.BlockSpec((HP, VP), lambda i: (0, 0)),
                pl.BlockSpec((1, VP), lambda i: (0, 0)),
            ],
            out_specs=pl.BlockSpec((row_tile, VP), lambda i: (i, 0)),
        ),
        compiler_params=pltpu.CompilerParams(
            dimension_semantics=("parallel",),
            vmem_limit_bytes=vmem_limit),
    )(x2, w_out, b_out)

    log_probs = log_probs_p.reshape(BP, T, VP)[:B, :, :V]
    new_hidden = h_fin[:B, :H][None]                      # (1, B, H)
    return log_probs, new_hidden


# ----------------------- pure-JAX reference (for check) ---------------------
# Mirrors the kernel's mixed precision (bf16 matmul operands, f32 accumulation
# and gate math) so the comparison is apples-to-apples.

def rnn_decoder_reference(tokens, lengths, h0, params):
    emb = params["embedding"]
    w_ih = params["w_ih"].astype(jnp.bfloat16)
    w_hh = params["w_hh"].astype(jnp.bfloat16)
    b_ih = params["b_ih"][0]
    b_hh = params["b_hh"][0]
    w_out = params["w_out"].astype(jnp.bfloat16)
    b_out = params["b_out"][0]

    B, T = tokens.shape
    H = h0.shape[-1]
    x = jnp.take(emb, tokens, axis=0).astype(jnp.bfloat16)      # (B, T, E)
    h = h0[0]
    outs = []
    for t in range(T):
        gx = jnp.dot(x[:, t], w_ih, preferred_element_type=jnp.float32) + b_ih
        gh = jnp.dot(h.astype(jnp.bfloat16), w_hh,
                     preferred_element_type=jnp.float32) + b_hh
        r = jax.nn.sigmoid(gx[:, :H] + gh[:, :H])
        z = jax.nn.sigmoid(gx[:, H:2 * H] + gh[:, H:2 * H])
        n = jnp.tanh(gx[:, 2 * H:] + r * gh[:, 2 * H:])
        h_new = (1.0 - z) * n + z * h
        mask = (t < lengths)[:, None]
        h = jnp.where(mask, h_new, h)
        outs.append(jnp.where(mask, h_new, 0.0))
    out_inputs = jnp.stack(outs, axis=1).astype(jnp.bfloat16)   # (B, T, H)
    logits = jnp.dot(out_inputs, w_out, preferred_element_type=jnp.float32) + b_out
    log_probs = jax.nn.log_softmax(logits, axis=-1)
    return log_probs, h[None]


# --------------------------------- main -------------------------------------

if __name__ == "__main__":
    # Small shapes consistent with the module defaults.
    B, T = 2, 8           # batch, max_len
    E = 32                # input_size (embedding dim)
    H = 32                # hidden_size
    V = 64                # output_size (vocab)

    key = jax.random.PRNGKey(0)
    keys = jax.random.split(key, 10)
    k = 1.0 / jnp.sqrt(H)

    params = {
        "embedding": jax.random.normal(keys[0], (V, E), jnp.float32) * 0.1,
        # PyTorch GRU weights are (3H, in); stored transposed as (in, 3H), gate order [r, z, n].
        "w_ih": jax.random.uniform(keys[1], (E, 3 * H), jnp.float32, -k, k),
        "w_hh": jax.random.uniform(keys[2], (H, 3 * H), jnp.float32, -k, k),
        "b_ih": jax.random.uniform(keys[3], (1, 3 * H), jnp.float32, -k, k),
        "b_hh": jax.random.uniform(keys[4], (1, 3 * H), jnp.float32, -k, k),
        # Output Linear: PyTorch weight (V, H) stored transposed as (H, V).
        "w_out": jax.random.uniform(keys[5], (H, V), jnp.float32, -k, k),
        "b_out": jax.random.uniform(keys[6], (1, V), jnp.float32, -k, k),
    }

    tokens = jax.random.randint(keys[7], (B, T), 0, V, dtype=jnp.int32)
    lengths = jnp.array([5, 8], dtype=jnp.int32)              # variable lengths
    h0 = jax.random.normal(keys[8], (1, B, H), jnp.float32) * 0.1

    fwd = jax.jit(rnn_decoder_forward)
    log_probs, new_hidden = fwd(tokens, lengths, h0, params)
    jax.block_until_ready((log_probs, new_hidden))

    ref_lp, ref_h = rnn_decoder_reference(tokens, lengths, h0, params)
    assert log_probs.shape == (B, T, V) and new_hidden.shape == (1, B, H)
    assert jnp.allclose(log_probs, ref_lp, atol=2e-3, rtol=2e-3), "log_probs mismatch"
    assert jnp.allclose(new_hidden, ref_h, atol=2e-3, rtol=2e-3), "hidden mismatch"

    # TODO(synk): attn_mode / feature_size branches of RNNDecoder are not exercised
    # (module defaults: attention disabled, no feature concatenation, dropout=0).
    print("KERNEL_OK")
</pallas_src>

<mosaic_0001>
module attributes {stable_mosaic.version = 11 : i64} {
  func.func @output_layer_kernel(%arg0: i32, %arg1: memref<64x128xf32, #tpu.memory_space<vmem>>, %arg2: memref<128x128xbf16, #tpu.memory_space<vmem>>, %arg3: memref<1x128xf32, #tpu.memory_space<vmem>>, %arg4: memref<64x128xf32, #tpu.memory_space<vmem>>) attributes {dimension_semantics = [#tpu.dimension_semantics<parallel>], iteration_bounds = array<i64: 1>, scalar_prefetch = 0 : i64, scratch_operands = 0 : i64, tpu.core_type = #tpu.core_type<tc>, window_params = [{transform_indices = @transform_0, window_bounds = array<i64: 64, 128>}, {pipeline_mode = #tpu.pipeline_mode<synchronous>, transform_indices = @transform_1, window_bounds = array<i64: 128, 128>}, {pipeline_mode = #tpu.pipeline_mode<synchronous>, transform_indices = @transform_2, window_bounds = array<i64: 1, 128>}, {transform_indices = @transform_3, window_bounds = array<i64: 64, 128>}]} {
    %c0 = arith.constant 0 : index
    %c0_0 = arith.constant 0 : index
    %0 = vector.load %arg1[%c0, %c0_0] : memref<64x128xf32, #tpu.memory_space<vmem>>, vector<64x128xf32>
    %1 = arith.truncf %0 : vector<64x128xf32> to vector<64x128xbf16>
    %c0_1 = arith.constant 0 : index
    %c0_2 = arith.constant 0 : index
    %2 = vector.load %arg2[%c0_1, %c0_2] : memref<128x128xbf16, #tpu.memory_space<vmem>>, vector<128x128xbf16>
    %cst = arith.constant dense<0.000000e+00> : vector<64x128xf32>
    %3 = tpu.matmul %1, %2, %cst {dimension_numbers = #tpu.dot_dimension_numbers<[1], [0], [0], [1], [0, 0, 1, 1], [], []>} : vector<64x128xbf16>, vector<128x128xbf16>, vector<64x128xf32> -> vector<64x128xf32>
    %c0_3 = arith.constant 0 : index
    %c0_4 = arith.constant 0 : index
    %4 = vector.load %arg3[%c0_3, %c0_4] : memref<1x128xf32, #tpu.memory_space<vmem>>, vector<1x128xf32>
    %5 = vector.broadcast %4 : vector<1x128xf32> to vector<64x128xf32>
    %6 = arith.addf %3, %5 : vector<64x128xf32>
    %cst_5 = arith.constant dense<0xFF800000> : vector<64xf32>
    %7 = vector.multi_reduction <maximumf>, %6, %cst_5 [1] : vector<64x128xf32> to vector<64xf32>
    %8 = vector.shape_cast %7 : vector<64xf32> to vector<64x1xf32>
    %9 = vector.broadcast %8 : vector<64x1xf32> to vector<64x128xf32>
    %10 = arith.subf %6, %9 : vector<64x128xf32>
    %11 = math.exp %10 : vector<64x128xf32>
    %cst_6 = arith.constant dense<0.000000e+00> : vector<64xf32>
    %12 = vector.multi_reduction <add>, %11, %cst_6 [1] : vector<64x128xf32> to vector<64xf32>
    %13 = vector.shape_cast %12 : vector<64xf32> to vector<64x1xf32>
    %14 = math.log %13 : vector<64x1xf32>
    %15 = vector.broadcast %14 : vector<64x1xf32> to vector<64x128xf32>
    %16 = arith.subf %10, %15 : vector<64x128xf32>
    %c0_7 = arith.constant 0 : index
    %c0_8 = arith.constant 0 : index
    %17 = vector.load %arg4[%c0_7, %c0_8] : memref<64x128xf32, #tpu.memory_space<vmem>>, vector<64x128xf32>
    tpu.vector_store %arg4[%c0_7, %c0_8], %16 {strides = array<i32>} : memref<64x128xf32, #tpu.memory_space<vmem>>, vector<64x128xf32>,
    return
  }
  func.func @transform_0(%arg0: i32) -> (i32, i32) {
    %c0_i32 = arith.constant 0 : i32
    %c0_i32_0 = arith.constant 0 : i32
    return %arg0, %c0_i32 : i32, i32
  }
  func.func @transform_1(%arg0: i32) -> (i32, i32) {
    %c0_i32 = arith.constant 0 : i32
    %c0_i32_0 = arith.constant 0 : i32
    %c0_i32_1 = arith.constant 0 : i32
    return %c0_i32, %c0_i32_0 : i32, i32
  }
  func.func @transform_2(%arg0: i32) -> (i32, i32) {
    %c0_i32 = arith.constant 0 : i32
    %c0_i32_0 = arith.constant 0 : i32
    %c0_i32_1 = arith.constant 0 : i32
    return %c0_i32, %c0_i32_0 : i32, i32
  }
  func.func @transform_3(%arg0: i32) -> (i32, i32) {
    %c0_i32 = arith.constant 0 : i32
    %c0_i32_0 = arith.constant 0 : i32
    return %arg0, %c0_i32 : i32, i32
  }
}

module attributes {stable_mosaic.version = 11 : i64} {
  func.func @gru_decoder_kernel(%arg0: i32, %arg1: memref<1x64x128xbf16, #tpu.memory_space<vmem>>, %arg2: memref<8x1xi32, #tpu.memory_space<vmem>>, %arg3: memref<8x128xf32, #tpu.memory_space<vmem>>, %arg4: memref<128x384xbf16, #tpu.memory_space<vmem>>, %arg5: memref<128x384xbf16, #tpu.memory_space<vmem>>, %arg6: memref<1x384xf32, #tpu.memory_space<vmem>>, %arg7: memref<1x128xf32, #tpu.memory_space<vmem>>, %arg8: memref<8x8x128xf32, #tpu.memory_space<vmem>>, %arg9: memref<8x128xf32, #tpu.memory_space<vmem>>, %arg10: memref<64x384xf32, #tpu.memory_space<vmem>>, %arg11: memref<64x128xf32, #tpu.memory_space<vmem>>) attributes {dimension_semantics = [#tpu.dimension_semantics<parallel>], iteration_bounds = array<i64: 1>, scalar_prefetch = 0 : i64, scratch_operands = 2 : i64, tpu.core_type = #tpu.core_type<tc>, window_params = [{transform_indices = @transform_0, window_bounds = array<i64: 1, 64, 128>}, {transform_indices = @transform_1, window_bounds = array<i64: 8, 1>}, {transform_indices = @transform_2, window_bounds = array<i64: 8, 128>}, {pipeline_mode = #tpu.pipeline_mode<synchronous>, transform_indices = @transform_3, window_bounds = array<i64: 128, 384>}, {pipeline_mode = #tpu.pipeline_mode<synchronous>, transform_indices = @transform_4, window_bounds = array<i64: 128, 384>}, {pipeline_mode = #tpu.pipeline_mode<synchronous>, transform_indices = @transform_5, window_bounds = array<i64: 1, 384>}, {pipeline_mode = #tpu.pipeline_mode<synchronous>, transform_indices = @transform_6, window_bounds = array<i64: 1, 128>}, {transform_indices = @transform_7, window_bounds = array<i64: 8, 8, 128>}, {transform_indices = @transform_8, window_bounds = array<i64: 8, 128>}]} {
    %c0 = arith.constant 0 : index
    %c0_0 = arith.constant 0 : index
    %c0_1 = arith.constant 0 : index
    %0 = vector.load %arg1[%c0, %c0_0, %c0_1] : memref<1x64x128xbf16, #tpu.memory_space<vmem>>, vector<1x64x128xbf16>
    %1 = vector.shape_cast %0 : vector<1x64x128xbf16> to vector<64x128xbf16>
    %c0_2 = arith.constant 0 : index
    %c0_3 = arith.constant 0 : index
    %2 = vector.load %arg4[%c0_2, %c0_3] : memref<128x384xbf16, #tpu.memory_space<vmem>>, vector<128x384xbf16>
    %cst = arith.constant dense<0.000000e+00> : vector<64x384xf32>
    %3 = tpu.matmul %1, %2, %cst {dimension_numbers = #tpu.dot_dimension_numbers<[1], [0], [0], [1], [0, 0, 1, 1], [], []>} : vector<64x128xbf16>, vector<128x384xbf16>, vector<64x384xf32> -> vector<64x384xf32>
    %c0_4 = arith.constant 0 : index
    %c0_5 = arith.constant 0 : index
    %4 = vector.load %arg6[%c0_4, %c0_5] : memref<1x384xf32, #tpu.memory_space<vmem>>, vector<1x384xf32>
    %5 = vector.broadcast %4 : vector<1x384xf32> to vector<64x384xf32>
    %6 = arith.addf %3, %5 : vector<64x384xf32>
    %c0_6 = arith.constant 0 : index
    %c0_7 = arith.constant 0 : index
    %7 = vector.load %arg10[%c0_6, %c0_7] : memref<64x384xf32, #tpu.memory_space<vmem>>, vector<64x384xf32>
    tpu.vector_store %arg10[%c0_6, %c0_7], %6 {strides = array<i32>} : memref<64x384xf32, #tpu.memory_space<vmem>>, vector<64x384xf32>,
    %c0_8 = arith.constant 0 : index
    %c0_9 = arith.constant 0 : index
    %8 = vector.load %arg5[%c0_8, %c0_9] : memref<128x384xbf16, #tpu.memory_space<vmem>>, vector<128x384xbf16>
    %c0_10 = arith.constant 0 : index
    %c0_11 = arith.constant 0 : index
    %9 = vector.load %arg7[%c0_10, %c0_11] : memref<1x128xf32, #tpu.memory_space<vmem>>, vector<1x128xf32>
    %10 = vector.shape_cast %9 : vector<1x128xf32> to vector<1x128xf32>
    %11 = vector.broadcast %10 : vector<1x128xf32> to vector<8x128xf32>
    %c0_12 = arith.constant 0 : index
    %c0_13 = arith.constant 0 : index
    %12 = vector.load %arg2[%c0_12, %c0_13] : memref<8x1xi32, #tpu.memory_space<vmem>>, vector<8x1xi32>
    %13 = vector.shape_cast %12 : vector<8x1xi32> to vector<8x1xi32>
    %14 = vector.broadcast %13 : vector<8x1xi32> to vector<8x128xi32>
    %c0_14 = arith.constant 0 : index
    %c0_15 = arith.constant 0 : index
    %15 = vector.load %arg3[%c0_14, %c0_15] : memref<8x128xf32, #tpu.memory_space<vmem>>, vector<8x128xf32>
    %c0_i32 = arith.constant 0 : i32
    %c8_i32 = arith.constant 8 : i32
    %16 = arith.muli %c0_i32, %c8_i32 : i32
    %17 = tpu.assume_multiple %16, 8 : i32
    %18 = arith.index_cast %17 : i32 to index
    %c0_16 = arith.constant 0 : index
    %19 = vector.load %arg10[%18, %c0_16] : memref<64x384xf32, #tpu.memory_space<vmem>>, vector<8x384xf32>
    %20 = arith.truncf %15 : vector<8x128xf32> to vector<8x128xbf16>
    %cst_17 = arith.constant dense<0.000000e+00> : vector<8x384xf32>
    %21 = tpu.matmul %20, %8, %cst_17 {dimension_numbers = #tpu.dot_dimension_numbers<[1], [0], [0], [1], [0, 0, 1, 1], [], []>} : vector<8x128xbf16>, vector<128x384xbf16>, vector<8x384xf32> -> vector<8x384xf32>
    %22 = vector.extract_strided_slice %19 {offsets = [0, 0], sizes = [8, 128], strides = [1, 1]} : vector<8x384xf32> to vector<8x128xf32>
    %23 = vector.extract_strided_slice %21 {offsets = [0, 0], sizes = [8, 128], strides = [1, 1]} : vector<8x384xf32> to vector<8x128xf32>
    %24 = arith.addf %22, %23 : vector<8x128xf32>
    %25 = arith.negf %24 : vector<8x128xf32>
    %26 = math.exp %25 : vector<8x128xf32>
    %cst_18 = arith.constant 1.000000e+00 : f32
    %27 = vector.broadcast %cst_18 : f32 to vector<8x128xf32>
    %28 = arith.addf %27, %26 : vector<8x128xf32>
    %29 = arith.divf %27, %28 : vector<8x128xf32>
    %30 = vector.extract_strided_slice %19 {offsets = [0, 128], sizes = [8, 128], strides = [1, 1]} : vector<8x384xf32> to vector<8x128xf32>
    %31 = vector.extract_strided_slice %21 {offsets = [0, 128], sizes = [8, 128], strides = [1, 1]} : vector<8x384xf32> to vector<8x128xf32>
    %32 = arith.addf %30, %31 : vector<8x128xf32>
    %33 = arith.negf %32 : vector<8x128xf32>
    %34 = math.exp %33 : vector<8x128xf32>
    %cst_19 = arith.constant 1.000000e+00 : f32
    %35 = vector.broadcast %cst_19 : f32 to vector<8x128xf32>
    %36 = arith.addf %35, %34 : vector<8x128xf32>
    %37 = arith.divf %35, %36 : vector<8x128xf32>
    %38 = vector.extract_strided_slice %19 {offsets = [0, 256], sizes = [8, 128], strides = [1, 1]} : vector<8x384xf32> to vector<8x128xf32>
    %39 = vector.extract_strided_slice %21 {offsets = [0, 256], sizes = [8, 128], strides = [1, 1]} : vector<8x384xf32> to vector<8x128xf32>
    %40 = arith.addf %39, %11 : vector<8x128xf32>
    %41 = arith.mulf %29, %40 : vector<8x128xf32>
    %42 = arith.addf %38, %41 : vector<8x128xf32>
    %43 = math.tanh %42 : vector<8x128xf32>
    %cst_20 = arith.constant 1.000000e+00 : f32
    %44 = vector.broadcast %cst_20 : f32 to vector<8x128xf32>
    %45 = arith.subf %44, %37 : vector<8x128xf32>
    %46 = arith.mulf %45, %43 : vector<8x128xf32>
    %47 = arith.mulf %37, %15 : vector<8x128xf32>
    %48 = arith.addf %46, %47 : vector<8x128xf32>
    %49 = vector.broadcast %c0_i32 : i32 to vector<8x128xi32>
    %50 = arith.cmpi slt, %49, %14 : vector<8x128xi32>
    %cst_21 = arith.constant 0.000000e+00 : f32
    %51 = vector.broadcast %cst_21 : f32 to vector<8x128xf32>
    %52 = arith.select %50, %48, %51 : vector<8x128xi1>, vector<8x128xf32>
    %53 = arith.index_cast %17 : i32 to index
    %c0_22 = arith.constant 0 : index
    %54 = vector.load %arg11[%53, %c0_22] : memref<64x128xf32, #tpu.memory_space<vmem>>, vector<8x128xf32>
    tpu.vector_store %arg11[%53, %c0_22], %52 {strides = array<i32>} : memref<64x128xf32, #tpu.memory_space<vmem>>, vector<8x128xf32>,
    %55 = arith.select %50, %48, %15 : vector<8x128xi1>, vector<8x128xf32>
    %c1_i32 = arith.constant 1 : i32
    %c8_i32_23 = arith.constant 8 : i32
    %56 = arith.muli %c1_i32, %c8_i32_23 : i32
    %57 = tpu.assume_multiple %56, 8 : i32
    %58 = arith.index_cast %57 : i32 to index
    %c0_24 = arith.constant 0 : index
    %59 = vector.load %arg10[%58, %c0_24] : memref<64x384xf32, #tpu.memory_space<vmem>>, vector<8x384xf32>
    %60 = arith.truncf %55 : vector<8x128xf32> to vector<8x128xbf16>
    %cst_25 = arith.constant dense<0.000000e+00> : vector<8x384xf32>
    %61 = tpu.matmul %60, %8, %cst_25 {dimension_numbers = #tpu.dot_dimension_numbers<[1], [0], [0], [1], [0, 0, 1, 1], [], []>} : vector<8x128xbf16>, vector<128x384xbf16>, vector<8x384xf32> -> vector<8x384xf32>
    %62 = vector.extract_strided_slice %59 {offsets = [0, 0], sizes = [8, 128], strides = [1, 1]} : vector<8x384xf32> to vector<8x128xf32>
    %63 = vector.extract_strided_slice %61 {offsets = [0, 0], sizes = [8, 128], strides = [1, 1]} : vector<8x384xf32> to vector<8x128xf32>
    %64 = arith.addf %62, %63 : vector<8x128xf32>
    %65 = arith.negf %64 : vector<8x128xf32>
    %66 = math.exp %65 : vector<8x128xf32>
    %cst_26 = arith.constant 1.000000e+00 : f32
    %67 = vector.broadcast %cst_26 : f32 to vector<8x128xf32>
    %68 = arith.addf %67, %66 : vector<8x128xf32>
    %69 = arith.divf %67, %68 : vector<8x128xf32>
    %70 = vector.extract_strided_slice %59 {offsets = [0, 128], sizes = [8, 128], strides = [1, 1]} : vector<8x384xf32> to vector<8x128xf32>
    %71 = vector.extract_strided_slice %61 {offsets = [0, 128], sizes = [8, 128], strides = [1, 1]} : vector<8x384xf32> to vector<8x128xf32>
    %72 = arith.addf %70, %71 : vector<8x128xf32>
    %73 = arith.negf %72 : vector<8x128xf32>
    %74 = math.exp %73 : vector<8x128xf32>
    %cst_27 = arith.constant 1.000000e+00 : f32
    %75 = vector.broadcast %cst_27 : f32 to vector<8x128xf32>
    %76 = arith.addf %75, %74 : vector<8x128xf32>
    %77 = arith.divf %75, %76 : vector<8x128xf32>
    %78 = vector.extract_strided_slice %59 {offsets = [0, 256], sizes = [8, 128], strides = [1, 1]} : vector<8x384xf32> to vector<8x128xf32>
    %79 = vector.extract_strided_slice %61 {offsets = [0, 256], sizes = [8, 128], strides = [1, 1]} : vector<8x384xf32> to vector<8x128xf32>
    %80 = arith.addf %79, %11 : vector<8x128xf32>
    %81 = arith.mulf %69, %80 : vector<8x128xf32>
    %82 = arith.addf %78, %81 : vector<8x128xf32>
    %83 = math.tanh %82 : vector<8x128xf32>
    %cst_28 = arith.constant 1.000000e+00 : f32
    %84 = vector.broadcast %cst_28 : f32 to vector<8x128xf32>
    %85 = arith.subf %84, %77 : vector<8x128xf32>
    %86 = arith.mulf %85, %83 : vector<8x128xf32>
    %87 = arith.mulf %77, %55 : vector<8x128xf32>
    %88 = arith.addf %86, %87 : vector<8x128xf32>
    %89 = vector.broadcast %c1_i32 : i32 to vector<8x128xi32>
    %90 = arith.cmpi slt, %89, %14 : vector<8x128xi32>
    %cst_29 = arith.constant 0.000000e+00 : f32
    %91 = vector.broadcast %cst_29 : f32 to vector<8x128xf32>
    %92 = arith.select %90, %88, %91 : vector<8x128xi1>, vector<8x128xf32>
    %93 = arith.index_cast %57 : i32 to index
    %c0_30 = arith.constant 0 : index
    %94 = vector.load %arg11[%93, %c0_30] : memref<64x128xf32, #tpu.memory_space<vmem>>, vector<8x128xf32>
    tpu.vector_store %arg11[%93, %c0_30], %92 {strides = array<i32>} : memref<64x128xf32, #tpu.memory_space<vmem>>, vector<8x128xf32>,
    %95 = arith.select %90, %88, %55 : vector<8x128xi1>, vector<8x128xf32>
    %c2_i32 = arith.constant 2 : i32
    %c8_i32_31 = arith.constant 8 : i32
    %96 = arith.muli %c2_i32, %c8_i32_31 : i32
    %97 = tpu.assume_multiple %96, 8 : i32
    %98 = arith.index_cast %97 : i32 to index
    %c0_32 = arith.constant 0 : index
    %99 = vector.load %arg10[%98, %c0_32] : memref<64x384xf32, #tpu.memory_space<vmem>>, vector<8x384xf32>
    %100 = arith.truncf %95 : vector<8x128xf32> to vector<8x128xbf16>
    %cst_33 = arith.constant dense<0.000000e+00> : vector<8x384xf32>
    %101 = tpu.matmul %100, %8, %cst_33 {dimension_numbers = #tpu.dot_dimension_numbers<[1], [0], [0], [1], [0, 0, 1, 1], [], []>} : vector<8x128xbf16>, vector<128x384xbf16>, vector<8x384xf32> -> vector<8x384xf32>
    %102 = vector.extract_strided_slice %99 {offsets = [0, 0], sizes = [8, 128], strides = [1, 1]} : vector<8x384xf32> to vector<8x128xf32>
    %103 = vector.extract_strided_slice %101 {offsets = [0, 0], sizes = [8, 128], strides = [1, 1]} : vector<8x384xf32> to vector<8x128xf32>
    %104 = arith.addf %102, %103 : vector<8x128xf32>
    %105 = arith.negf %104 : vector<8x128xf32>
    %106 = math.exp %105 : vector<8x128xf32>
    %cst_34 = arith.constant 1.000000e+00 : f32
    %107 = vector.broadcast %cst_34 : f32 to vector<8x128xf32>
    %108 = arith.addf %107, %106 : vector<8x128xf32>
    %109 = arith.divf %107, %108 : vector<8x128xf32>
    %110 = vector.extract_strided_slice %99 {offsets = [0, 128], sizes = [8, 128], strides = [1, 1]} : vector<8x384xf32> to vector<8x128xf32>
    %111 = vector.extract_strided_slice %101 {offsets = [0, 128], sizes = [8, 128], strides = [1, 1]} : vector<8x384xf32> to vector<8x128xf32>
    %112 = arith.addf %110, %111 : vector<8x128xf32>
    %113 = arith.negf %112 : vector<8x128xf32>
    %114 = math.exp %113 : vector<8x128xf32>
    %cst_35 = arith.constant 1.000000e+00 : f32
    %115 = vector.broadcast %cst_35 : f32 to vector<8x128xf32>
    %116 = arith.addf %115, %114 : vector<8x128xf32>
    %117 = arith.divf %115, %116 : vector<8x128xf32>
    %118 = vector.extract_strided_slice %99 {offsets = [0, 256], sizes = [8, 128], strides = [1, 1]} : vector<8x384xf32> to vector<8x128xf32>
    %119 = vector.extract_strided_slice %101 {offsets = [0, 256], sizes = [8, 128], strides = [1, 1]} : vector<8x384xf32> to vector<8x128xf32>
    %120 = arith.addf %119, %11 : vector<8x128xf32>
    %121 = arith.mulf %109, %120 : vector<8x128xf32>
    %122 = arith.addf %118, %121 : vector<8x128xf32>
    %123 = math.tanh %122 : vector<8x128xf32>
    %cst_36 = arith.constant 1.000000e+00 : f32
    %124 = vector.broadcast %cst_36 : f32 to vector<8x128xf32>
    %125 = arith.subf %124, %117 : vector<8x128xf32>
    %126 = arith.mulf %125, %123 : vector<8x128xf32>
    %127 = arith.mulf %117, %95 : vector<8x128xf32>
    %128 = arith.addf %126, %127 : vector<8x128xf32>
    %129 = vector.broadcast %c2_i32 : i32 to vector<8x128xi32>
    %130 = arith.cmpi slt, %129, %14 : vector<8x128xi32>
    %cst_37 = arith.constant 0.000000e+00 : f32
    %131 = vector.broadcast %cst_37 : f32 to vector<8x128xf32>
    %132 = arith.select %130, %128, %131 : vector<8x128xi1>, vector<8x128xf32>
    %133 = arith.index_cast %97 : i32 to index
    %c0_38 = arith.constant 0 : index
    %134 = vector.load %arg11[%133, %c0_38] : memref<64x128xf32, #tpu.memory_space<vmem>>, vector<8x128xf32>
    tpu.vector_store %arg11[%133, %c0_38], %132 {strides = array<i32>} : memref<64x128xf32, #tpu.memory_space<vmem>>, vector<8x128xf32>,
    %135 = arith.select %130, %128, %95 : vector<8x128xi1>, vector<8x128xf32>
    %c3_i32 = arith.constant 3 : i32
    %c8_i32_39 = arith.constant 8 : i32
    %136 = arith.muli %c3_i32, %c8_i32_39 : i32
    %137 = tpu.assume_multiple %136, 8 : i32
    %138 = arith.index_cast %137 : i32 to index
    %c0_40 = arith.constant 0 : index
    %139 = vector.load %arg10[%138, %c0_40] : memref<64x384xf32, #tpu.memory_space<vmem>>, vector<8x384xf32>
    %140 = arith.truncf %135 : vector<8x128xf32> to vector<8x128xbf16>
    %cst_41 = arith.constant dense<0.000000e+00> : vector<8x384xf32>
    %141 = tpu.matmul %140, %8, %cst_41 {dimension_numbers = #tpu.dot_dimension_numbers<[1], [0], [0], [1], [0, 0, 1, 1], [], []>} : vector<8x128xbf16>, vector<128x384xbf16>, vector<8x384xf32> -> vector<8x384xf32>
    %142 = vector.extract_strided_slice %139 {offsets = [0, 0], sizes = [8, 128], strides = [1, 1]} : vector<8x384xf32> to vector<8x128xf32>
    %143 = vector.extract_strided_slice %141 {offsets = [0, 0], sizes = [8, 128], strides = [1, 1]} : vector<8x384xf32> to vector<8x128xf32>
    %144 = arith.addf %142, %143 : vector<8x128xf32>
    %145 = arith.negf %144 : vector<8x128xf32>
    %146 = math.exp %145 : vector<8x128xf32>
    %cst_42 = arith.constant 1.000000e+00 : f32
    %147 = vector.broadcast %cst_42 : f32 to vector<8x128xf32>
    %148 = arith.addf %147, %146 : vector<8x128xf32>
    %149 = arith.divf %147, %148 : vector<8x128xf32>
    %150 = vector.extract_strided_slice %139 {offsets = [0, 128], sizes = [8, 128], strides = [1, 1]} : vector<8x384xf32> to vector<8x128xf32>
    %151 = vector.extract_strided_slice %141 {offsets = [0, 128], sizes = [8, 128], strides = [1, 1]} : vector<8x384xf32> to vector<8x128xf32>
    %152 = arith.addf %150, %151 : vector<8x128xf32>
    %153 = arith.negf %152 : vector<8x128xf32>
    %154 = math.exp %153 : vector<8x128xf32>
    %cst_43 = arith.constant 1.000000e+00 : f32
    %155 = vector.broadcast %cst_43 : f32 to vector<8x128xf32>
    %156 = arith.addf %155, %154 : vector<8x128xf32>
    %157 = arith.divf %155, %156 : vector<8x128xf32>
    %158 = vector.extract_strided_slice %139 {offsets = [0, 256], sizes = [8, 128], strides = [1, 1]} : vector<8x384xf32> to vector<8x128xf32>
    %159 = vector.extract_strided_slice %141 {offsets = [0, 256], sizes = [8, 128], strides = [1, 1]} : vector<8x384xf32> to vector<8x128xf32>
    %160 = arith.addf %159, %11 : vector<8x128xf32>
    %161 = arith.mulf %149, %160 : vector<8x128xf32>
    %162 = arith.addf %158, %161 : vector<8x128xf32>
    %163 = math.tanh %162 : vector<8x128xf32>
    %cst_44 = arith.constant 1.000000e+00 : f32
    %164 = vector.broadcast %cst_44 : f32 to vector<8x128xf32>
    %165 = arith.subf %164, %157 : vector<8x128xf32>
    %166 = arith.mulf %165, %163 : vector<8x128xf32>
    %167 = arith.mulf %157, %135 : vector<8x128xf32>
    %168 = arith.addf %166, %167 : vector<8x128xf32>
    %169 = vector.broadcast %c3_i32 : i32 to vector<8x128xi32>
    %170 = arith.cmpi slt, %169, %14 : vector<8x128xi32>
    %cst_45 = arith.constant 0.000000e+00 : f32
    %171 = vector.broadcast %cst_45 : f32 to vector<8x128xf32>
    %172 = arith.select %170, %168, %171 : vector<8x128xi1>, vector<8x128xf32>
    %173 = arith.index_cast %137 : i32 to index
    %c0_46 = arith.constant 0 : index
    %174 = vector.load %arg11[%173, %c0_46] : memref<64x128xf32, #tpu.memory_space<vmem>>, vector<8x128xf32>
    tpu.vector_store %arg11[%173, %c0_46], %172 {strides = array<i32>} : memref<64x128xf32, #tpu.memory_space<vmem>>, vector<8x128xf32>,
    %175 = arith.select %170, %168, %135 : vector<8x128xi1>, vector<8x128xf32>
    %c4_i32 = arith.constant 4 : i32
    %c8_i32_47 = arith.constant 8 : i32
    %176 = arith.muli %c4_i32, %c8_i32_47 : i32
    %177 = tpu.assume_multiple %176, 8 : i32
    %178 = arith.index_cast %177 : i32 to index
    %c0_48 = arith.constant 0 : index
    %179 = vector.load %arg10[%178, %c0_48] : memref<64x384xf32, #tpu.memory_space<vmem>>, vector<8x384xf32>
    %180 = arith.truncf %175 : vector<8x128xf32> to vector<8x128xbf16>
    %cst_49 = arith.constant dense<0.000000e+00> : vector<8x384xf32>
    %181 = tpu.matmul %180, %8, %cst_49 {dimension_numbers = #tpu.dot_dimension_numbers<[1], [0], [0], [1], [0, 0, 1, 1], [], []>} : vector<8x128xbf16>, vector<128x384xbf16>, vector<8x384xf32> -> vector<8x384xf32>
    %182 = vector.extract_strided_slice %179 {offsets = [0, 0], sizes = [8, 128], strides = [1, 1]} : vector<8x384xf32> to vector<8x128xf32>
    %183 = vector.extract_strided_slice %181 {offsets = [0, 0], sizes = [8, 128], strides = [1, 1]} : vector<8x384xf32> to vector<8x128xf32>
    %184 = arith.addf %182, %183 : vector<8x128xf32>
    %185 = arith.negf %184 : vector<8x128xf32>
    %186 = math.exp %185 : vector<8x128xf32>
    %cst_50 = arith.constant 1.000000e+00 : f32
    %187 = vector.broadcast %cst_50 : f32 to vector<8x128xf32>
    %188 = arith.addf %187, %186 : vector<8x128xf32>
    %189 = arith.divf %187, %188 : vector<8x128xf32>
    %190 = vector.extract_strided_slice %179 {offsets = [0, 128], sizes = [8, 128], strides = [1, 1]} : vector<8x384xf32> to vector<8x128xf32>
    %191 = vector.extract_strided_slice %181 {offsets = [0, 128], sizes = [8, 128], strides = [1, 1]} : vector<8x384xf32> to vector<8x128xf32>
    %192 = arith.addf %190, %191 : vector<8x128xf32>
    %193 = arith.negf %192 : vector<8x128xf32>
    %194 = math.exp %193 : vector<8x128xf32>
    %cst_51 = arith.constant 1.000000e+00 : f32
    %195 = vector.broadcast %cst_51 : f32 to vector<8x128xf32>
    %196 = arith.addf %195, %194 : vector<8x128xf32>
    %197 = arith.divf %195, %196 : vector<8x128xf32>
    %198 = vector.extract_strided_slice %179 {offsets = [0, 256], sizes = [8, 128], strides = [1, 1]} : vector<8x384xf32> to vector<8x128xf32>
    %199 = vector.extract_strided_slice %181 {offsets = [0, 256], sizes = [8, 128], strides = [1, 1]} : vector<8x384xf32> to vector<8x128xf32>
    %200 = arith.addf %199, %11 : vector<8x128xf32>
    %201 = arith.mulf %189, %200 : vector<8x128xf32>
    %202 = arith.addf %198, %201 : vector<8x128xf32>
    %203 = math.tanh %202 : vector<8x128xf32>
    %cst_52 = arith.constant 1.000000e+00 : f32
    %204 = vector.broadcast %cst_52 : f32 to vector<8x128xf32>
    %205 = arith.subf %204, %197 : vector<8x128xf32>
    %206 = arith.mulf %205, %203 : vector<8x128xf32>
    %207 = arith.mulf %197, %175 : vector<8x128xf32>
    %208 = arith.addf %206, %207 : vector<8x128xf32>
    %209 = vector.broadcast %c4_i32 : i32 to vector<8x128xi32>
    %210 = arith.cmpi slt, %209, %14 : vector<8x128xi32>
    %cst_53 = arith.constant 0.000000e+00 : f32
    %211 = vector.broadcast %cst_53 : f32 to vector<8x128xf32>
    %212 = arith.select %210, %208, %211 : vector<8x128xi1>, vector<8x128xf32>
    %213 = arith.index_cast %177 : i32 to index
    %c0_54 = arith.constant 0 : index
    %214 = vector.load %arg11[%213, %c0_54] : memref<64x128xf32, #tpu.memory_space<vmem>>, vector<8x128xf32>
    tpu.vector_store %arg11[%213, %c0_54], %212 {strides = array<i32>} : memref<64x128xf32, #tpu.memory_space<vmem>>, vector<8x128xf32>,
    %215 = arith.select %210, %208, %175 : vector<8x128xi1>, vector<8x128xf32>
    %c5_i32 = arith.constant 5 : i32
    %c8_i32_55 = arith.constant 8 : i32
    %216 = arith.muli %c5_i32, %c8_i32_55 : i32
    %217 = tpu.assume_multiple %216, 8 : i32
    %218 = arith.index_cast %217 : i32 to index
    %c0_56 = arith.constant 0 : index
    %219 = vector.load %arg10[%218, %c0_56] : memref<64x384xf32, #tpu.memory_space<vmem>>, vector<8x384xf32>
    %220 = arith.truncf %215 : vector<8x128xf32> to vector<8x128xbf16>
    %cst_57 = arith.constant dense<0.000000e+00> : vector<8x384xf32>
    %221 = tpu.matmul %220, %8, %cst_57 {dimension_numbers = #tpu.dot_dimension_numbers<[1], [0], [0], [1], [0, 0, 1, 1], [], []>} : vector<8x128xbf16>, vector<128x384xbf16>, vector<8x384xf32> -> vector<8x384xf32>
    %222 = vector.extract_strided_slice %219 {offsets = [0, 0], sizes = [8, 128], strides = [1, 1]} : vector<8x384xf32> to vector<8x128xf32>
    %223 = vector.extract_strided_slice %221 {offsets = [0, 0], sizes = [8, 128], strides = [1, 1]} : vector<8x384xf32> to vector<8x128xf32>
    %224 = arith.addf %222, %223 : vector<8x128xf32>
    %225 = arith.negf %224 : vector<8x128xf32>
    %226 = math.exp %225 : vector<8x128xf32>
    %cst_58 = arith.constant 1.000000e+00 : f32
    %227 = vector.broadcast %cst_58 : f32 to vector<8x128xf32>
    %228 = arith.addf %227, %226 : vector<8x128xf32>
    %229 = arith.divf %227, %228 : vector<8x128xf32>
    %230 = vector.extract_strided_slice %219 {offsets = [0, 128], sizes = [8, 128], strides = [1, 1]} : vector<8x384xf32> to vector<8x128xf32>
    %231 = vector.extract_strided_slice %221 {offsets = [0, 128], sizes = [8, 128], strides = [1, 1]} : vector<8x384xf32> to vector<8x128xf32>
    %232 = arith.addf %230, %231 : vector<8x128xf32>
    %233 = arith.negf %232 : vector<8x128xf32>
    %234 = math.exp %233 : vector<8x128xf32>
    %cst_59 = arith.constant 1.000000e+00 : f32
    %235 = vector.broadcast %cst_59 : f32 to vector<8x128xf32>
    %236 = arith.addf %235, %234 : vector<8x128xf32>
    %237 = arith.divf %235, %236 : vector<8x128xf32>
    %238 = vector.extract_strided_slice %219 {offsets = [0, 256], sizes = [8, 128], strides = [1, 1]} : vector<8x384xf32> to vector<8x128xf32>
    %239 = vector.extract_strided_slice %221 {offsets = [0, 256], sizes = [8, 128], strides = [1, 1]} : vector<8x384xf32> to vector<8x128xf32>
    %240 = arith.addf %239, %11 : vector<8x128xf32>
    %241 = arith.mulf %229, %240 : vector<8x128xf32>
    %242 = arith.addf %238, %241 : vector<8x128xf32>
    %243 = math.tanh %242 : vector<8x128xf32>
    %cst_60 = arith.constant 1.000000e+00 : f32
    %244 = vector.broadcast %cst_60 : f32 to vector<8x128xf32>
    %245 = arith.subf %244, %237 : vector<8x128xf32>
    %246 = arith.mulf %245, %243 : vector<8x128xf32>
    %247 = arith.mulf %237, %215 : vector<8x128xf32>
    %248 = arith.addf %246, %247 : vector<8x128xf32>
    %249 = vector.broadcast %c5_i32 : i32 to vector<8x128xi32>
    %250 = arith.cmpi slt, %249, %14 : vector<8x128xi32>
    %cst_61 = arith.constant 0.000000e+00 : f32
    %251 = vector.broadcast %cst_61 : f32 to vector<8x128xf32>
    %252 = arith.select %250, %248, %251 : vector<8x128xi1>, vector<8x128xf32>
    %253 = arith.index_cast %217 : i32 to index
    %c0_62 = arith.constant 0 : index
    %254 = vector.load %arg11[%253, %c0_62] : memref<64x128xf32, #tpu.memory_space<vmem>>, vector<8x128xf32>
    tpu.vector_store %arg11[%253, %c0_62], %252 {strides = array<i32>} : memref<64x128xf32, #tpu.memory_space<vmem>>, vector<8x128xf32>,
    %255 = arith.select %250, %248, %215 : vector<8x128xi1>, vector<8x128xf32>
    %c6_i32 = arith.constant 6 : i32
    %c8_i32_63 = arith.constant 8 : i32
    %256 = arith.muli %c6_i32, %c8_i32_63 : i32
    %257 = tpu.assume_multiple %256, 8 : i32
    %258 = arith.index_cast %257 : i32 to index
    %c0_64 = arith.constant 0 : index
    %259 = vector.load %arg10[%258, %c0_64] : memref<64x384xf32, #tpu.memory_space<vmem>>, vector<8x384xf32>
    %260 = arith.truncf %255 : vector<8x128xf32> to vector<8x128xbf16>
    %cst_65 = arith.constant dense<0.000000e+00> : vector<8x384xf32>
    %261 = tpu.matmul %260, %8, %cst_65 {dimension_numbers = #tpu.dot_dimension_numbers<[1], [0], [0], [1], [0, 0, 1, 1], [], []>} : vector<8x128xbf16>, vector<128x384xbf16>, vector<8x384xf32> -> vector<8x384xf32>
    %262 = vector.extract_strided_slice %259 {offsets = [0, 0], sizes = [8, 128], strides = [1, 1]} : vector<8x384xf32> to vector<8x128xf32>
    %263 = vector.extract_strided_slice %261 {offsets = [0, 0], sizes = [8, 128], strides = [1, 1]} : vector<8x384xf32> to vector<8x128xf32>
    %264 = arith.addf %262, %263 : vector<8x128xf32>
    %265 = arith.negf %264 : vector<8x128xf32>
    %266 = math.exp %265 : vector<8x128xf32>
    %cst_66 = arith.constant 1.000000e+00 : f32
    %267 = vector.broadcast %cst_66 : f32 to vector<8x128xf32>
    %268 = arith.addf %267, %266 : vector<8x128xf32>
    %269 = arith.divf %267, %268 : vector<8x128xf32>
    %270 = vector.extract_strided_slice %259 {offsets = [0, 128], sizes = [8, 128], strides = [1, 1]} : vector<8x384xf32> to vector<8x128xf32>
    %271 = vector.extract_strided_slice %261 {offsets = [0, 128], sizes = [8, 128], strides = [1, 1]} : vector<8x384xf32> to vector<8x128xf32>
    %272 = arith.addf %270, %271 : vector<8x128xf32>
    %273 = arith.negf %272 : vector<8x128xf32>
    %274 = math.exp %273 : vector<8x128xf32>
    %cst_67 = arith.constant 1.000000e+00 : f32
    %275 = vector.broadcast %cst_67 : f32 to vector<8x128xf32>
    %276 = arith.addf %275, %274 : vector<8x128xf32>
    %277 = arith.divf %275, %276 : vector<8x128xf32>
    %278 = vector.extract_strided_slice %259 {offsets = [0, 256], sizes = [8, 128], strides = [1, 1]} : vector<8x384xf32> to vector<8x128xf32>
    %279 = vector.extract_strided_slice %261 {offsets = [0, 256], sizes = [8, 128], strides = [1, 1]} : vector<8x384xf32> to vector<8x128xf32>
    %280 = arith.addf %279, %11 : vector<8x128xf32>
    %281 = arith.mulf %269, %280 : vector<8x128xf32>
    %282 = arith.addf %278, %281 : vector<8x128xf32>
    %283 = math.tanh %282 : vector<8x128xf32>
    %cst_68 = arith.constant 1.000000e+00 : f32
    %284 = vector.broadcast %cst_68 : f32 to vector<8x128xf32>
    %285 = arith.subf %284, %277 : vector<8x128xf32>
    %286 = arith.mulf %285, %283 : vector<8x128xf32>
    %287 = arith.mulf %277, %255 : vector<8x128xf32>
    %288 = arith.addf %286, %287 : vector<8x128xf32>
    %289 = vector.broadcast %c6_i32 : i32 to vector<8x128xi32>
    %290 = arith.cmpi slt, %289, %14 : vector<8x128xi32>
    %cst_69 = arith.constant 0.000000e+00 : f32
    %291 = vector.broadcast %cst_69 : f32 to vector<8x128xf32>
    %292 = arith.select %290, %288, %291 : vector<8x128xi1>, vector<8x128xf32>
    %293 = arith.index_cast %257 : i32 to index
    %c0_70 = arith.constant 0 : index
    %294 = vector.load %arg11[%293, %c0_70] : memref<64x128xf32, #tpu.memory_space<vmem>>, vector<8x128xf32>
    tpu.vector_store %arg11[%293, %c0_70], %292 {strides = array<i32>} : memref<64x128xf32, #tpu.memory_space<vmem>>, vector<8x128xf32>,
    %295 = arith.select %290, %288, %255 : vector<8x128xi1>, vector<8x128xf32>
    %c7_i32 = arith.constant 7 : i32
    %c8_i32_71 = arith.constant 8 : i32
    %296 = arith.muli %c7_i32, %c8_i32_71 : i32
    %297 = tpu.assume_multiple %296, 8 : i32
    %298 = arith.index_cast %297 : i32 to index
    %c0_72 = arith.constant 0 : index
    %299 = vector.load %arg10[%298, %c0_72] : memref<64x384xf32, #tpu.memory_space<vmem>>, vector<8x384xf32>
    %300 = arith.truncf %295 : vector<8x128xf32> to vector<8x128xbf16>
    %cst_73 = arith.constant dense<0.000000e+00> : vector<8x384xf32>
    %301 = tpu.matmul %300, %8, %cst_73 {dimension_numbers = #tpu.dot_dimension_numbers<[1], [0], [0], [1], [0, 0, 1, 1], [], []>} : vector<8x128xbf16>, vector<128x384xbf16>, vector<8x384xf32> -> vector<8x384xf32>
    %302 = vector.extract_strided_slice %299 {offsets = [0, 0], sizes = [8, 128], strides = [1, 1]} : vector<8x384xf32> to vector<8x128xf32>
    %303 = vector.extract_strided_slice %301 {offsets = [0, 0], sizes = [8, 128], strides = [1, 1]} : vector<8x384xf32> to vector<8x128xf32>
    %304 = arith.addf %302, %303 : vector<8x128xf32>
    %305 = arith.negf %304 : vector<8x128xf32>
    %306 = math.exp %305 : vector<8x128xf32>
    %cst_74 = arith.constant 1.000000e+00 : f32
    %307 = vector.broadcast %cst_74 : f32 to vector<8x128xf32>
    %308 = arith.addf %307, %306 : vector<8x128xf32>
    %309 = arith.divf %307, %308 : vector<8x128xf32>
    %310 = vector.extract_strided_slice %299 {offsets = [0, 128], sizes = [8, 128], strides = [1, 1]} : vector<8x384xf32> to vector<8x128xf32>
    %311 = vector.extract_strided_slice %301 {offsets = [0, 128], sizes = [8, 128], strides = [1, 1]} : vector<8x384xf32> to vector<8x128xf32>
    %312 = arith.addf %310, %311 : vector<8x128xf32>
    %313 = arith.negf %312 : vector<8x128xf32>
    %314 = math.exp %313 : vector<8x128xf32>
    %cst_75 = arith.constant 1.000000e+00 : f32
    %315 = vector.broadcast %cst_75 : f32 to vector<8x128xf32>
    %316 = arith.addf %315, %314 : vector<8x128xf32>
    %317 = arith.divf %315, %316 : vector<8x128xf32>
    %318 = vector.extract_strided_slice %299 {offsets = [0, 256], sizes = [8, 128], strides = [1, 1]} : vector<8x384xf32> to vector<8x128xf32>
    %319 = vector.extract_strided_slice %301 {offsets = [0, 256], sizes = [8, 128], strides = [1, 1]} : vector<8x384xf32> to vector<8x128xf32>
    %320 = arith.addf %319, %11 : vector<8x128xf32>
    %321 = arith.mulf %309, %320 : vector<8x128xf32>
    %322 = arith.addf %318, %321 : vector<8x128xf32>
    %323 = math.tanh %322 : vector<8x128xf32>
    %cst_76 = arith.constant 1.000000e+00 : f32
    %324 = vector.broadcast %cst_76 : f32 to vector<8x128xf32>
    %325 = arith.subf %324, %317 : vector<8x128xf32>
    %326 = arith.mulf %325, %323 : vector<8x128xf32>
    %327 = arith.mulf %317, %295 : vector<8x128xf32>
    %328 = arith.addf %326, %327 : vector<8x128xf32>
    %329 = vector.broadcast %c7_i32 : i32 to vector<8x128xi32>
    %330 = arith.cmpi slt, %329, %14 : vector<8x128xi32>
    %cst_77 = arith.constant 0.000000e+00 : f32
    %331 = vector.broadcast %cst_77 : f32 to vector<8x128xf32>
    %332 = arith.select %330, %328, %331 : vector<8x128xi1>, vector<8x128xf32>
    %333 = arith.index_cast %297 : i32 to index
    %c0_78 = arith.constant 0 : index
    %334 = vector.load %arg11[%333, %c0_78] : memref<64x128xf32, #tpu.memory_space<vmem>>, vector<8x128xf32>
    tpu.vector_store %arg11[%333, %c0_78], %332 {strides = array<i32>} : memref<64x128xf32, #tpu.memory_space<vmem>>, vector<8x128xf32>,
    %335 = arith.select %330, %328, %295 : vector<8x128xi1>, vector<8x128xf32>
    %c8_i32_79 = arith.constant 8 : i32
    %c0_80 = arith.constant 0 : index
    %c0_81 = arith.constant 0 : index
    %336 = vector.load %arg9[%c0_80, %c0_81] : memref<8x128xf32, #tpu.memory_space<vmem>>, vector<8x128xf32>
    tpu.vector_store %arg9[%c0_80, %c0_81], %335 {strides = array<i32>} : memref<8x128xf32, #tpu.memory_space<vmem>>, vector<8x128xf32>,
    %c0_82 = arith.constant 0 : index
    %c0_83 = arith.constant 0 : index
    %337 = vector.load %arg11[%c0_82, %c0_83] : memref<64x128xf32, #tpu.memory_space<vmem>>, vector<8x128xf32>
    %c0_84 = arith.constant 0 : index
    %c0_85 = arith.constant 0 : index
    %c0_86 = arith.constant 0 : index
    %338 = vector.load %arg8[%c0_84, %c0_85, %c0_86] : memref<8x8x128xf32, #tpu.memory_space<vmem>>, vector<8x1x128xf32>
    %339 = vector.shape_cast %338 : vector<8x1x128xf32> to vector<8x128xf32>
    %340 = vector.shape_cast %337 : vector<8x128xf32> to vector<8x1x128xf32>
    tpu.vector_store %arg8[%c0_84, %c0_85, %c0_86], %340 {strides = array<i32>} : memref<8x8x128xf32, #tpu.memory_space<vmem>>, vector<8x1x128xf32>,
    %c8 = arith.constant 8 : index
    %c0_87 = arith.constant 0 : index
    %341 = vector.load %arg11[%c8, %c0_87] : memref<64x128xf32, #tpu.memory_space<vmem>>, vector<8x128xf32>
    %c0_88 = arith.constant 0 : index
    %c1 = arith.constant 1 : index
    %c0_89 = arith.constant 0 : index
    %342 = vector.load %arg8[%c0_88, %c1, %c0_89] : memref<8x8x128xf32, #tpu.memory_space<vmem>>, vector<8x1x128xf32>
    %343 = vector.shape_cast %342 : vector<8x1x128xf32> to vector<8x128xf32>
    %344 = vector.shape_cast %341 : vector<8x128xf32> to vector<8x1x128xf32>
    tpu.vector_store %arg8[%c0_88, %c1, %c0_89], %344 {strides = array<i32>} : memref<8x8x128xf32, #tpu.memory_space<vmem>>, vector<8x1x128xf32>,
    %c16 = arith.constant 16 : index
    %c0_90 = arith.constant 0 : index
    %345 = vector.load %arg11[%c16, %c0_90] : memref<64x128xf32, #tpu.memory_space<vmem>>, vector<8x128xf32>
    %c0_91 = arith.constant 0 : index
    %c2 = arith.constant 2 : index
    %c0_92 = arith.constant 0 : index
    %346 = vector.load %arg8[%c0_91, %c2, %c0_92] : memref<8x8x128xf32, #tpu.memory_space<vmem>>, vector<8x1x128xf32>
    %347 = vector.shape_cast %346 : vector<8x1x128xf32> to vector<8x128xf32>
    %348 = vector.shape_cast %345 : vector<8x128xf32> to vector<8x1x128xf32>
    tpu.vector_store %arg8[%c0_91, %c2, %c0_92], %348 {strides = array<i32>} : memref<8x8x128xf32, #tpu.memory_space<vmem>>, vector<8x1x128xf32>,
    %c24 = arith.constant 24 : index
    %c0_93 = arith.constant 0 : index
    %349 = vector.load %arg11[%c24, %c0_93] : memref<64x128xf32, #tpu.memory_space<vmem>>, vector<8x128xf32>
    %c0_94 = arith.constant 0 : index
    %c3 = arith.constant 3 : index
    %c0_95 = arith.constant 0 : index
    %350 = vector.load %arg8[%c0_94, %c3, %c0_95] : memref<8x8x128xf32, #tpu.memory_space<vmem>>, vector<8x1x128xf32>
    %351 = vector.shape_cast %350 : vector<8x1x128xf32> to vector<8x128xf32>
    %352 = vector.shape_cast %349 : vector<8x128xf32> to vector<8x1x128xf32>
    tpu.vector_store %arg8[%c0_94, %c3, %c0_95], %352 {strides = array<i32>} : memref<8x8x128xf32, #tpu.memory_space<vmem>>, vector<8x1x128xf32>,
    %c32 = arith.constant 32 : index
    %c0_96 = arith.constant 0 : index
    %353 = vector.load %arg11[%c32, %c0_96] : memref<64x128xf32, #tpu.memory_space<vmem>>, vector<8x128xf32>
    %c0_97 = arith.constant 0 : index
    %c4 = arith.constant 4 : index
    %c0_98 = arith.constant 0 : index
    %354 = vector.load %arg8[%c0_97, %c4, %c0_98] : memref<8x8x128xf32, #tpu.memory_space<vmem>>, vector<8x1x128xf32>
    %355 = vector.shape_cast %354 : vector<8x1x128xf32> to vector<8x128xf32>
    %356 = vector.shape_cast %353 : vector<8x128xf32> to vector<8x1x128xf32>
    tpu.vector_store %arg8[%c0_97, %c4, %c0_98], %356 {strides = array<i32>} : memref<8x8x128xf32, #tpu.memory_space<vmem>>, vector<8x1x128xf32>,
    %c40 = arith.constant 40 : index
    %c0_99 = arith.constant 0 : index
    %357 = vector.load %arg11[%c40, %c0_99] : memref<64x128xf32, #tpu.memory_space<vmem>>, vector<8x128xf32>
    %c0_100 = arith.constant 0 : index
    %c5 = arith.constant 5 : index
    %c0_101 = arith.constant 0 : index
    %358 = vector.load %arg8[%c0_100, %c5, %c0_101] : memref<8x8x128xf32, #tpu.memory_space<vmem>>, vector<8x1x128xf32>
    %359 = vector.shape_cast %358 : vector<8x1x128xf32> to vector<8x128xf32>
    %360 = vector.shape_cast %357 : vector<8x128xf32> to vector<8x1x128xf32>
    tpu.vector_store %arg8[%c0_100, %c5, %c0_101], %360 {strides = array<i32>} : memref<8x8x128xf32, #tpu.memory_space<vmem>>, vector<8x1x128xf32>,
    %c48 = arith.constant 48 : index
    %c0_102 = arith.constant 0 : index
    %361 = vector.load %arg11[%c48, %c0_102] : memref<64x128xf32, #tpu.memory_space<vmem>>, vector<8x128xf32>
    %c0_103 = arith.constant 0 : index
    %c6 = arith.constant 6 : index
    %c0_104 = arith.constant 0 : index
    %362 = vector.load %arg8[%c0_103, %c6, %c0_104] : memref<8x8x128xf32, #tpu.memory_space<vmem>>, vector<8x1x128xf32>
    %363 = vector.shape_cast %362 : vector<8x1x128xf32> to vector<8x128xf32>
    %364 = vector.shape_cast %361 : vector<8x128xf32> to vector<8x1x128xf32>
    tpu.vector_store %arg8[%c0_103, %c6, %c0_104], %364 {strides = array<i32>} : memref<8x8x128xf32, #tpu.memory_space<vmem>>, vector<8x1x128xf32>,
    %c56 = arith.constant 56 : index
    %c0_105 = arith.constant 0 : index
    %365 = vector.load %arg11[%c56, %c0_105] : memref<64x128xf32, #tpu.memory_space<vmem>>, vector<8x128xf32>
    %c0_106 = arith.constant 0 : index
    %c7 = arith.constant 7 : index
    %c0_107 = arith.constant 0 : index
    %366 = vector.load %arg8[%c0_106, %c7, %c0_107] : memref<8x8x128xf32, #tpu.memory_space<vmem>>, vector<8x1x128xf32>
    %367 = vector.shape_cast %366 : vector<8x1x128xf32> to vector<8x128xf32>
    %368 = vector.shape_cast %365 : vector<8x128xf32> to vector<8x1x128xf32>
    tpu.vector_store %arg8[%c0_106, %c7, %c0_107], %368 {strides = array<i32>} : memref<8x8x128xf32, #tpu.memory_space<vmem>>, vector<8x1x128xf32>,
    return
  }
  func.func @transform_0(%arg0: i32) -> (i32, i32, i32) {
    %c0_i32 = arith.constant 0 : i32
    %c0_i32_0 = arith.constant 0 : i32
    %c0_i32_1 = arith.constant 0 : i32
    return %arg0, %c0_i32, %c0_i32_0 : i32, i32, i32
  }
  func.func @transform_1(%arg0: i32) -> (i32, i32) {
    %c0_i32 = arith.constant 0 : i32
    %c0_i32_0 = arith.constant 0 : i32
    return %arg0, %c0_i32 : i32, i32
  }
  func.func @transform_2(%arg0: i32) -> (i32, i32) {
    %c0_i32 = arith.constant 0 : i32
    %c0_i32_0 = arith.constant 0 : i32
    return %arg0, %c0_i32 : i32, i32
  }
  func.func @transform_3(%arg0: i32) -> (i32, i32) {
    %c0_i32 = arith.constant 0 : i32
    %c0_i32_0 = arith.constant 0 : i32
    %c0_i32_1 = arith.constant 0 : i32
    return %c0_i32, %c0_i32_0 : i32, i32
  }
  func.func @transform_4(%arg0: i32) -> (i32, i32) {
    %c0_i32 = arith.constant 0 : i32
    %c0_i32_0 = arith.constant 0 : i32
    %c0_i32_1 = arith.constant 0 : i32
    return %c0_i32, %c0_i32_0 : i32, i32
  }
  func.func @transform_5(%arg0: i32) -> (i32, i32) {
    %c0_i32 = arith.constant 0 : i32
    %c0_i32_0 = arith.constant 0 : i32
    %c0_i32_1 = arith.constant 0 : i32
    return %c0_i32, %c0_i32_0 : i32, i32
  }
  func.func @transform_6(%arg0: i32) -> (i32, i32) {
    %c0_i32 = arith.constant 0 : i32
    %c0_i32_0 = arith.constant 0 : i32
    %c0_i32_1 = arith.constant 0 : i32
    return %c0_i32, %c0_i32_0 : i32, i32
  }
  func.func @transform_7(%arg0: i32) -> (i32, i32, i32) {
    %c0_i32 = arith.constant 0 : i32
    %c0_i32_0 = arith.constant 0 : i32
    %c0_i32_1 = arith.constant 0 : i32
    return %arg0, %c0_i32, %c0_i32_0 : i32, i32, i32
  }
  func.func @transform_8(%arg0: i32) -> (i32, i32) {
    %c0_i32 = arith.constant 0 : i32
    %c0_i32_0 = arith.constant 0 : i32
    return %arg0, %c0_i32 : i32, i32
  }
}

</mosaic_0001>

<bundles_post_ra>
// kernel: rnn_decoder_forward.3
= control target key start
LH: loop header
LB: loop body
LE: loop exit
PB: predicated region body
PF: predicated region fallthrough
CT: control target
= control target key end

     0   :  { %s483_s1 = inlined_call_operand.vmem [shape: bf16[128,128], index: 1, kind: input, shape index: {}]   ;;  %s484_s0 = inlined_call_operand.vmem [shape: f32[64,128], index: 0, kind: input, shape index: {}]   ;;  %s485_s2 = inlined_call_operand.vmem [shape: f32[1,128], index: 2, kind: input, shape index: {}]   ;;  %s486_s3 = inlined_call_operand.vmem [shape: f32[64,128], index: 3, kind: output, shape index: {}]  }
   0x1   :  { %v316_v0 = vld [vmem:[%s483_s1] sm:$0xff]   ;;  %v317_v1 = vld [vmem:[%s483_s1 + $0x8] sm:$0xff]   ;;  %v318_v2 = vld [vmem:[%s483_s1 + $0x10] sm:$0xff]  }
   0x2   :  { %276 = vmatprep.subr.bf16.mxu0 %v316_v0  ;;  %300 = vmatprep.subr.bf16.mxu1 %v316_v0  ;;  %v319_v3 = vld [vmem:[%s483_s1 + $0x18] sm:$0xff]   ;;  %v15_v4 = vld [vmem:[%s484_s0] sm:$0xff]  ;;  %v16_v5 = vld [vmem:[%s484_s0 + $0x8] sm:$0xff] }
   0x3   :  { %277 = vmatpush3.bf16.msra.mxu0 %v316_v0  ;;  %308 = vmatpush3.bf16.msra.mxu1 %v316_v0  ;;  %v23_v6 = vpack.c.bf16 %v16_v5, %v15_v4  ;;  %v19_v7 = vld [vmem:[%s484_s0 + $0x20] sm:$0xff]  ;;  %v20_v8 = vld [vmem:[%s484_s0 + $0x28] sm:$0xff]  ;;  %v322_v12 = vld [vmem:[%s483_s1 + $0x30] sm:$0xff]  }
   0x4   :  { %278 = vmatprep.subr.bf16.mxu0 %v317_v1  ;;  %301 = vmatprep.subr.bf16.mxu1 %v317_v1  ;;  %v25_v9 = vpack.c.bf16 %v20_v8, %v19_v7  ;;  %v320_v10 = vld [vmem:[%s483_s1 + $0x20] sm:$0xff]   ;;  %v321_v11 = vld [vmem:[%s483_s1 + $0x28] sm:$0xff]   ;;  %v323_v13 = vld [vmem:[%s483_s1 + $0x38] sm:$0xff]  }
   0x5   :  { %292 = vmatprep.mubr.bf16.mxu0 %v23_v6  ;;  %v17_v14 = vld [vmem:[%s484_s0 + $0x10] sm:$0xff]  ;;  %v18_v15 = vld [vmem:[%s484_s0 + $0x18] sm:$0xff]  ;;  %v255_v20 = vld [vmem:[%s485_s2] ss:$0 sm:$0xff] }
   0x6   :  { %296 = vmatprep.mubr.bf16.mxu1 %v25_v9  ;;  %v21_v16 = vld [vmem:[%s484_s0 + $0x30] sm:$0xff]  ;;  %v22_v17 = vld [vmem:[%s484_s0 + $0x38] sm:$0xff]  ;;  %v24_v18 = vpack.c.bf16 %v18_v15, %v17_v14 }
   0x7   :  { %279 = vmatpush3.bf16.msra.mxu0 %v317_v1  ;;  %309 = vmatpush3.bf16.msra.mxu1 %v317_v1  ;;  %v26_v19 = vpack.c.bf16 %v22_v17, %v21_v16 }
   0x8   :  { %280 = vmatprep.subr.bf16.mxu0 %v318_v2  ;;  %302 = vmatprep.subr.bf16.mxu1 %v318_v2 }
   0xb   :  { %281 = vmatpush3.bf16.msra.mxu0 %v318_v2  ;;  %310 = vmatpush3.bf16.msra.mxu1 %v318_v2 }
   0xc   :  { %282 = vmatprep.subr.bf16.mxu0 %v319_v3  ;;  %303 = vmatprep.subr.bf16.mxu1 %v319_v3 }
   0xf   :  { %283 = vmatpush3.bf16.msra.mxu0 %v319_v3  ;;  %311 = vmatpush3.bf16.msra.mxu1 %v319_v3 }
  0x10   :  { %284 = vmatprep.subr.bf16.mxu0 %v320_v10  ;;  %304 = vmatprep.subr.bf16.mxu1 %v320_v10 }
  0x13   :  { %285 = vmatpush3.bf16.msra.mxu0 %v320_v10  ;;  %312 = vmatpush3.bf16.msra.mxu1 %v320_v10 }
  0x14   :  { %286 = vmatprep.subr.bf16.mxu0 %v321_v11  ;;  %305 = vmatprep.subr.bf16.mxu1 %v321_v11 }
  0x17   :  { %287 = vmatpush3.bf16.msra.mxu0 %v321_v11  ;;  %313 = vmatpush3.bf16.msra.mxu1 %v321_v11 }
  0x18   :  { %288 = vmatprep.subr.bf16.mxu0 %v322_v12  ;;  %306 = vmatprep.subr.bf16.mxu1 %v322_v12 }
  0x1b   :  { %289 = vmatpush3.bf16.msra.mxu0 %v322_v12  ;;  %314 = vmatpush3.bf16.msra.mxu1 %v322_v12 }
  0x1c   :  { %290 = vmatprep.subr.bf16.mxu0 %v323_v13  ;;  %307 = vmatprep.subr.bf16.mxu1 %v323_v13 }
  0x1f   :  { %291 = vmatpush3.bf16.msra.mxu0 %v323_v13  ;;  %315 = vmatpush3.bf16.msra.mxu1 %v323_v13 }
  0x22   :  { %293 = vmatmul.mubr.bf16.vlgmr.msra.gmra.mrb[0].mxu0 %v24_v18  ;;  %297 = vmatmul.mubr.bf16.vlgmr.msra.gmra.mrb[0].mxu1 %v26_v19 }
  0xf5   :  { %v294_v21 = vpop.f32.mrb[0].mxu0  ;;  %v298_v22 = vpop.f32.mrb[0].mxu1 }
  0xf6   :  { %v141_v23 = vadd.f32 %v294_v21, %v255_v20  ;;  %v132_v24 = vpop.f32.mrb[1].mxu0  ;;  %v148_v25 = vpop.f32.mrb[1].mxu1  ;;  %v157_v36 = vadd.f32 %v298_v22, %v255_v20 }
  0xf7   :  { %v133_v26 = vadd.f32 %v255_v20, %v132_v24  ;;  %v295_v27 = vpop.f32.mrb[2].mxu0  ;;  %v299_v28 = vpop.f32.mrb[2].mxu1  ;;  %v149_v31 = vadd.f32 %v255_v20, %v148_v25 }
  0xf8   :  { %167 = vmax.xlane.f32.xlu1 %v141_v23  ;;  %v135_v29 = vpop.f32.mrb[3].mxu0  ;;  %v151_v30 = vpop.f32.mrb[3].mxu1  ;;  %v144_v32 = vadd.f32 %v295_v27, %v255_v20  ;;  %v160_v35 = vadd.f32 %v299_v28, %v255_v20 }
  0xf9   :  { %163 = vmax.xlane.f32.xlu0 %v133_v26  ;;  %v152_v33 = vadd.f32 %v255_v20, %v151_v30  ;;  %v136_v34 = vadd.f32 %v255_v20, %v135_v29 }
  0xfc   :  { %169 = vmax.xlane.f32.xlu1 %v144_v32 }
  0xfd   :  { %171 = vmax.xlane.f32.xlu0 %v149_v31 }
 0x100   :  { %173 = vmax.xlane.f32.xlu1 %v152_v33 }
 0x101   :  { %165 = vmax.xlane.f32.xlu0 %v136_v34 }
 0x104   :  { %177 = vmax.xlane.f32.xlu1 %v160_v35 }
 0x105   :  { %175 = vmax.xlane.f32.xlu0 %v157_v36 }
 0x185   :  { %v168_v37 = vpop.xlane.xlu1 %167 }
 0x186   :  { %v427_v38 = vsub.f32 %v141_v23, %v168_v37  ;;  %v164_v39 = vpop.xlane.xlu0 %163 }
 0x187   :  { %v429_v40 = vsub.f32 %v133_v26, %v164_v39 }
 0x188   :  { %v191_v41 = vmul.f32 1.442695, %v427_v38 }
 0x189   :  { %v187_v42 = vmul.f32 1.442695, %v429_v40  ;;  %v170_v43 = vpop.xlane.xlu1 %169 }
 0x18a   :  { %324 = vpow2.f32 %v191_v41  ;;  %v433_v44 = vsub.f32 %v144_v32, %v170_v43  ;;  %v172_v45 = vpop.xlane.xlu0 %171 }
 0x18b   :  { %v435_v46 = vsub.f32 %v149_v31, %v172_v45  ;;  %326 = vpow2.f32 %v187_v42 }
 0x18c   :  { %v193_v47 = vmul.f32 1.442695, %v433_v44 }
 0x18d   :  { %v174_v48 = vpop.xlane.xlu1 %173  ;;  %v195_v49 = vmul.f32 1.442695, %v435_v46 }
 0x18e   :  { %328 = vpow2.f32 %v193_v47  ;;  %v439_v50 = vsub.f32 %v152_v33, %v174_v48  ;;  %v166_v51 = vpop.xlane.xlu0 %165 }
 0x18f   :  { %v441_v52 = vsub.f32 %v136_v34, %v166_v51  ;;  %330 = vpow2.f32 %v195_v49 }
 0x190   :  { %v197_v55 = vmul.f32 1.442695, %v439_v50 }
 0x191   :  { %v189_v53 = vmul.f32 1.442695, %v441_v52  ;;  %v178_v54 = vpop.xlane.xlu1 %177 }
 0x192   :  { %v176_v56 = vpop.xlane.xlu0 %175  ;;  %v445_v57 = vsub.f32 %v160_v35, %v178_v54 }
 0x193   :  { %332 = vpow2.f32 %v189_v53  ;;  %v447_v58 = vsub.f32 %v157_v36, %v176_v56 }
 0x194   :  { %v325_v59 = vpop.eup %324  ;;  %334 = vpow2.f32 %v197_v55  ;;  %v201_v62 = vmul.f32 1.442695, %v445_v57 }
 0x195   :  { %v199_v60 = vmul.f32 1.442695, %v447_v58  ;;  %207 = vadd.xlane.f32.xlu0 %v325_v59  ;;  %v327_v61 = vpop.eup %326 }
 0x197   :  { %336 = vpow2.f32 %v199_v60 }
 0x198   :  { %v329_v63 = vpop.eup %328  ;;  %338 = vpow2.f32 %v201_v62 }
 0x199   :  { %209 = vadd.xlane.f32.xlu1 %v329_v63  ;;  %203 = vadd.xlane.f32.xlu0 %v327_v61  ;;  %v331_v0 = vpop.eup %330 }
 0x19d   :  { %v333_v1 = vpop.eup %332  ;;  %211 = vadd.xlane.f32.xlu0 %v331_v0 }
 0x19e   :  { %205 = vadd.xlane.f32.xlu1 %v333_v1  ;;  %v335_v2 = vpop.eup %334 }
 0x1a1   :  { %v337_v3 = vpop.eup %336 }
 0x1a2   :  { %213 = vadd.xlane.f32.xlu1 %v335_v2  ;;  %215 = vadd.xlane.f32.xlu0 %v337_v3  ;;  %v339_v4 = vpop.eup %338 }
 0x1a6   :  { %217 = vadd.xlane.f32.xlu1 %v339_v4 }
 0x222   :  { %v208_v5 = vpop.xlane.xlu0 %207 }
 0x223   :  { %340 = vlog2.f32 %v208_v5 }
 0x226   :  { %v210_v6 = vpop.xlane.xlu1 %209  ;;  %v204_v7 = vpop.xlane.xlu0 %203 }
 0x227   :  { %342 = vlog2.f32 %v210_v6 }
 0x228   :  { %344 = vlog2.f32 %v204_v7 }
 0x22a   :  { %v212_v8 = vpop.xlane.xlu0 %211 }
 0x22b   :  { %346 = vlog2.f32 %v212_v8  ;;  %v206_v9 = vpop.xlane.xlu1 %205 }
 0x22c   :  { %348 = vlog2.f32 %v206_v9 }
 0x22d   :  { %v341_v10 = vpop.eup %340 }
 0x22e   :  { %v224_v11 = vmul.f32 0.6931472, %v341_v10 }
 0x22f   :  { %v214_v12 = vpop.xlane.xlu1 %213  ;;  %v216_v13 = vpop.xlane.xlu0 %215 }
 0x230   :  { %v237_v14 = vsub.f32 %v427_v38, %v224_v11  ;;  %350 = vlog2.f32 %v214_v12 }
 0x231   :  { %v343_v15 = vpop.eup %342  ;;  %352 = vlog2.f32 %v216_v13 }
 0x232   :  { %v345_v16 = vpop.eup %344  ;;  %245 = vst [vmem:[%s486_s3 + $0x10] sm:$0xff] %v237_v14  ;;  %v226_v17 = vmul.f32 0.6931472, %v343_v15 }
 0x233   :  { %v220_v18 = vmul.f32 0.6931472, %v345_v16  ;;  %v218_v19 = vpop.xlane.xlu1 %217 }
 0x234   :  { %v238_v20 = vsub.f32 %v433_v44, %v226_v17  ;;  %354 = vlog2.f32 %v218_v19 }
 0x235   :  { %v347_v21 = vpop.eup %346  ;;  %v235_v22 = vsub.f32 %v429_v40, %v220_v18 }
 0x236   :  { %v349_v23 = vpop.eup %348  ;;  %246 = vst [vmem:[%s486_s3 + $0x18] sm:$0xff] %v238_v20  ;;  %v228_v24 = vmul.f32 0.6931472, %v347_v21 }
 0x237   :  { %243 = vst [vmem:[%s486_s3] sm:$0xff] %v235_v22  ;;  %v222_v25 = vmul.f32 0.6931472, %v349_v23 }
 0x238   :  { %v239_v26 = vsub.f32 %v435_v46, %v228_v24 }
 0x239   :  { %v236_v27 = vsub.f32 %v441_v52, %v222_v25 }
 0x23a   :  { %v351_v28 = vpop.eup %350  ;;  %247 = vst [vmem:[%s486_s3 + $0x20] sm:$0xff] %v239_v26 }
 0x23b   :  { %v353_v29 = vpop.eup %352  ;;  %244 = vst [vmem:[%s486_s3 + $0x8] sm:$0xff] %v236_v27  ;;  %v230_v30 = vmul.f32 0.6931472, %v351_v28 }
 0x23c   :  { %v232_v31 = vmul.f32 0.6931472, %v353_v29 }
 0x23d   :  { %v240_v32 = vsub.f32 %v439_v50, %v230_v30 }
 0x23e   :  { %v355_v33 = vpop.eup %354  ;;  %v241_v34 = vsub.f32 %v447_v58, %v232_v31 }
 0x23f   :  { %248 = vst [vmem:[%s486_s3 + $0x28] sm:$0xff] %v240_v32  ;;  %v234_v35 = vmul.f32 0.6931472, %v355_v33 }
 0x240   :  { %249 = vst [vmem:[%s486_s3 + $0x30] sm:$0xff] %v241_v34 }
 0x241   :  { %v242_v36 = vsub.f32 %v445_v57, %v234_v35 }
 0x243   :  { %250 = vst [vmem:[%s486_s3 + $0x38] sm:$0xff] %v242_v36 }

// kernel: rnn_decoder_forward.2
= control target key start
LH: loop header
LB: loop body
LE: loop exit
PB: predicated region body
PF: predicated region fallthrough
CT: control target
= control target key end

     0   :  { %v3656_v1 = vmov 0   ;;  %v3658_v34 = vmov 0.0   ;;  %vm2592_vm0 = vmmov 0   ;;  %v71_v57 = vlaneseq  ;;  %s3647_s3 = inlined_call_operand.vmem [shape: bf16[128,384], index: 3, kind: input, shape index: {}]   ;;  %s3648_s0 = inlined_call_operand.vmem [shape: bf16[1,64,128], index: 0, kind: input, shape index: {}]   ;;  %s3649_s4 = inlined_call_operand.vmem [shape: bf16[128,384], index: 4, kind: input, shape index: {}]   ;;  %s3650_s1 = inlined_call_operand.vmem [shape: s32[8,1], index: 1, kind: input, shape index: {}]   ;;  %s3651_s2 = inlined_call_operand.vmem [shape: f32[8,128], index: 2, kind: input, shape index: {}]   ;;  %s3652_s5 = inlined_call_operand.vmem [shape: f32[1,384], index: 5, kind: input, shape index: {}]   ;;  %s3653_s6 = inlined_call_operand.vmem [shape: f32[1,128], index: 6, kind: input, shape index: {}]   ;;  %s3654_s7 = inlined_call_operand.vmem [shape: f32[8,8,128], index: 7, kind: output, shape index: {0}]   ;;  %s3655_s8 = inlined_call_operand.vmem [shape: f32[8,128], index: 8, kind: output, shape index: {1}]  }
   0x1   :  { %v2417_v0 = vld [vmem:[%s3647_s3 + $0x4] ss:$12 sps:$4 sm:$0xff]   ;;  %270 = vmatprep.mubr.bf16.mxu0 %v3656_v1  ;;  %2416 = vset.pattern.permute.xlu0 %v3656_v1  ;;  %v2419_v2 = vld [vmem:[%s3647_s3] ss:$12 sps:$4 sm:$0xff]   ;;  %v2420_v3 = vld [vmem:[%s3647_s3 + $0x1c] ss:$12 sps:$4 sm:$0xff]  }
   0x2   :  { %238 = vmatprep.subr.bf16.mxu0 %v2417_v0  ;;  %v2422_v4 = vld [vmem:[%s3647_s3 + $0x18] ss:$12 sps:$4 sm:$0xff]   ;;  %v2423_v5 = vld [vmem:[%s3647_s3 + $0x34] ss:$12 sps:$4 sm:$0xff]   ;;  %v2425_v6 = vld [vmem:[%s3647_s3 + $0x30] ss:$12 sps:$4 sm:$0xff]  }
   0x3   :  { %239 = vmatpush1.bf16.msra.mxu0 %v2419_v2  ;;  %v2426_v7 = vld [vmem:[%s3647_s3 + $0x4c] ss:$12 sps:$4 sm:$0xff]   ;;  %v2437_v8 = vld [vmem:[%s3647_s3 + $0x8] ss:$12 sps:$4 sm:$0xff]   ;;  %v2429_v10 = vld [vmem:[%s3647_s3 + $0x64] ss:$12 sps:$4 sm:$0xff]  }
   0x4   :  { %240 = vmatprep.subr.bf16.mxu0 %v2420_v3  ;;  %v2428_v9 = vld [vmem:[%s3647_s3 + $0x48] ss:$12 sps:$4 sm:$0xff]   ;;  %2228 = vmatprep.subr.bf16.mxu1 %v2437_v8  ;;  %v2441_v11 = vld [vmem:[%s3647_s3 + $0x20] ss:$12 sps:$4 sm:$0xff]   ;;  %v2444_v13 = vld [vmem:[%s3647_s3 + $0x38] ss:$12 sps:$4 sm:$0xff]  }
   0x5   :  { %2229 = vmatpush3.bf16.msra.mxu1 %v2437_v8  ;;  %v2443_v12 = vld [vmem:[%s3648_s0] sm:$0xff]   ;;  %v2432_v15 = vld [vmem:[%s3647_s3 + $0x7c] ss:$12 sps:$4 sm:$0xff]   ;;  %v2439_v21 = vld [vmem:[%s3647_s3 + $0xac] ss:$12 sps:$4 sm:$0xff]   ;;  %v2930_v58 = vshrl.u32 %v71_v57, 7 }
   0x6   :  { %2230 = vmatprep.subr.bf16.mxu1 %v2441_v11  ;;  %v2431_v14 = vld [vmem:[%s3647_s3 + $0x60] ss:$12 sps:$4 sm:$0xff]   ;;  %2244 = vmatprep.mubr.bf16.mxu1 %v2443_v12  ;;  %v2448_v16 = vld [vmem:[%s3647_s3 + $0x50] ss:$12 sps:$4 sm:$0xff]   ;;  %v2434_v17 = vld [vmem:[%s3647_s3 + $0x78] ss:$12 sps:$4 sm:$0xff]  }
   0x7   :  { %241 = vmatpush1.bf16.msra.mxu0 %v2422_v4  ;;  %v2435_v18 = vld [vmem:[%s3647_s3 + $0x94] ss:$12 sps:$4 sm:$0xff]   ;;  %v2438_v20 = vld [vmem:[%s3647_s3 + $0x90] ss:$12 sps:$4 sm:$0xff]   ;;  %v2462_v25 = vld [vmem:[%s3647_s3 + $0x98] ss:$12 sps:$4 sm:$0xff]  }
   0x8   :  { %242 = vmatprep.subr.bf16.mxu0 %v2423_v5  ;;  %v2453_v19 = vld [vmem:[%s3647_s3 + $0x68] ss:$12 sps:$4 sm:$0xff]   ;;  %v2457_v22 = vld [vmem:[%s3647_s3 + $0x80] ss:$12 sps:$4 sm:$0xff]   ;;  %v2713_v24 = vld [vmem:[%s3649_s4 + $0x4] ss:$12 sps:$4 sm:$0xff]  }
   0x9   :  { %2231 = vmatpush3.bf16.msra.mxu1 %v2441_v11  ;;  %v2442_v23 = vld [vmem:[%s3647_s3 + $0xa8] ss:$12 sps:$4 sm:$0xff]   ;;  %v2721_v26 = vld [vmem:[%s3649_s4] ss:$12 sps:$4 sm:$0xff]   ;;  %v2466_v28 = vld [vmem:[%s3647_s3 + $0xb0] ss:$12 sps:$4 sm:$0xff]  }
   0xa   :  { %2232 = vmatprep.subr.bf16.mxu1 %v2444_v13  ;;  %v2727_v27 = vld [vmem:[%s3649_s4 + $0x1c] ss:$12 sps:$4 sm:$0xff]   ;;  %v2736_v29 = vld [vmem:[%s3649_s4 + $0x18] ss:$12 sps:$4 sm:$0xff]   ;;  %v2743_v30 = vld [vmem:[%s3649_s4 + $0x34] ss:$12 sps:$4 sm:$0xff]  }
   0xb   :  { %243 = vmatpush1.bf16.msra.mxu0 %v2425_v6  ;;  %v2452_v31 = vld [vmem:[%s3648_s0 + $0x8] sm:$0xff]   ;;  %v2752_v32 = vld [vmem:[%s3649_s4 + $0x30] ss:$12 sps:$4 sm:$0xff]   ;;  %v439_v36 = vld [vmem:[%s3650_s1] sm:$0xff]  ;;  %v73_v59 = vsub.s32 0, %v2930_v58  ;;  %v77_v61 = vsub.s32 1, %v2930_v58 }
   0xc   :  { %244 = vmatprep.subr.bf16.mxu0 %v2426_v7  ;;  %v2758_v33 = vld [vmem:[%s3649_s4 + $0x4c] ss:$12 sps:$4 sm:$0xff]   ;;  %v2764_v35 = vld [vmem:[%s3649_s4 + $0x8] ss:$12 sps:$4 sm:$0xff]   ;;  %441 = vperm.xlu0 %2416, %v439_v36   ;;  %v2783_v39 = vld [vmem:[%s3649_s4 + $0x64] ss:$12 sps:$4 sm:$0xff]  }
   0xd   :  { %2233 = vmatpush3.bf16.msra.mxu1 %v2444_v13  ;;  %v2773_v37 = vld [vmem:[%s3649_s4 + $0x48] ss:$12 sps:$4 sm:$0xff]   ;;  %v2789_v40 = vld [vmem:[%s3649_s4 + $0x20] ss:$12 sps:$4 sm:$0xff]   ;;  %v2808_v43 = vld [vmem:[%s3649_s4 + $0x38] ss:$12 sps:$4 sm:$0xff]  }
   0xe   :  { %2234 = vmatprep.subr.bf16.mxu1 %v2448_v16  ;;  %v2461_v38 = vld [vmem:[%s3648_s0 + $0x10] sm:$0xff]   ;;  %v2796_v41 = vld [vmem:[%s3649_s4 + $0x60] ss:$12 sps:$4 sm:$0xff]   ;;  %v2802_v42 = vld [vmem:[%s3649_s4 + $0x7c] ss:$12 sps:$4 sm:$0xff]   ;;  %v81_v6 = vsub.s32 2, %v2930_v58 }
   0xf   :  { %245 = vmatpush1.bf16.msra.mxu0 %v2428_v9  ;;  %v2470_v44 = vld [vmem:[%s3648_s0 + $0x18] sm:$0xff]   ;;  %v2825_v46 = vld [vmem:[%s3649_s4 + $0x94] ss:$12 sps:$4 sm:$0xff]  }
  0x10   :  { %246 = vmatprep.subr.bf16.mxu0 %v2429_v10  ;;  %v2818_v45 = vld [vmem:[%s3649_s4 + $0x78] ss:$12 sps:$4 sm:$0xff]   ;;  %v2831_v47 = vld [vmem:[%s3649_s4 + $0x50] ss:$12 sps:$4 sm:$0xff]   ;;  %v2852_v50 = vld [vmem:[%s3649_s4 + $0x68] ss:$12 sps:$4 sm:$0xff]  }
  0x11   :  { %2235 = vmatpush3.bf16.msra.mxu1 %v2448_v16  ;;  %v2840_v48 = vld [vmem:[%s3649_s4 + $0x90] ss:$12 sps:$4 sm:$0xff]   ;;  %v2846_v49 = vld [vmem:[%s3649_s4 + $0xac] ss:$12 sps:$4 sm:$0xff]   ;;  %v2859_v51 = vld [vmem:[%s3649_s4 + $0xa8] ss:$12 sps:$4 sm:$0xff]  }
  0x12   :  { %2236 = vmatprep.subr.bf16.mxu1 %v2453_v19  ;;  %v2865_v52 = vld [vmem:[%s3651_s2] sm:$0xff]  ;;  %v2893_v56 = vld [vmem:[%s3649_s4 + $0xb0] ss:$12 sps:$4 sm:$0xff]  }
  0x13   :  { %247 = vmatpush1.bf16.msra.mxu0 %v2431_v14  ;;  %v2872_v53 = vld [vmem:[%s3649_s4 + $0x80] ss:$12 sps:$4 sm:$0xff]   ;;  %v450_v54 = vpack.c.bf16 %v2865_v52, %v2865_v52  ;;  %v2883_v55 = vld [vmem:[%s3649_s4 + $0x98] ss:$12 sps:$4 sm:$0xff]  }
  0x14   :  { %248 = vmatprep.subr.bf16.mxu0 %v2432_v15  ;;  %v69_v60 = vld [vmem:[%s3652_s5] sm:$0x7] }
  0x15   :  { %2237 = vmatpush3.bf16.msra.mxu1 %v2453_v19  ;;  %v74_v63 = vrot.slane %v69_v60, %v73_v59  ;;  %v78_v2 = vrot.slane %v69_v60, %v77_v61  ;;  %v2942_v8 = vrot.slane %v69_v60, %v81_v6 }
  0x16   :  { %2238 = vmatprep.subr.bf16.mxu1 %v2457_v22 }
  0x17   :  { %249 = vmatpush1.bf16.msra.mxu0 %v2434_v17 }
  0x18   :  { %250 = vmatprep.subr.bf16.mxu0 %v2435_v18 }
  0x19   :  { %2239 = vmatpush3.bf16.msra.mxu1 %v2457_v22 }
  0x1a   :  { %2240 = vmatprep.subr.bf16.mxu1 %v2462_v25 }
  0x1b   :  { %251 = vmatpush1.bf16.msra.mxu0 %v2438_v20 }
  0x1c   :  { %252 = vmatprep.subr.bf16.mxu0 %v2439_v21 }
  0x1d   :  { %2241 = vmatpush3.bf16.msra.mxu1 %v2462_v25 }
  0x1e   :  { %2242 = vmatprep.subr.bf16.mxu1 %v2466_v28 }
  0x1f   :  { %253 = vmatpush1.bf16.msra.mxu0 %v2442_v23 }
  0x20   :  { %579 = vmatprep.subr.bf16.mxu0 %v2713_v24 }
  0x21   :  { %2243 = vmatpush3.bf16.msra.mxu1 %v2466_v28 }
  0x22   :  { %271 = vmatmul.mubr.bf16.vlgmr.msra.gmra.mrb[0].mxu0 %v2443_v12  ;;  %2252 = vmatprep.subr.bf16.mxu1 %v3658_v34 }
  0x23   :  { %580 = vmatpush1.bf16.msra.mxu0 %v2721_v26  ;;  %280 = vmatprep.mubr.bf16.mxu0 %v3656_v1 }
  0x24   :  { %581 = vmatprep.subr.bf16.mxu0 %v2727_v27  ;;  %2245 = vmatmul.mubr.bf16.vlgmr.msra.gmra.mrb[0].mxu1 %v2452_v31 }
  0x25   :  { %2253 = vmatpush3.bf16.msra.mxu1 %v2764_v35  ;;  %2248 = vmatprep.mubr.bf16.mxu1 %v2461_v38 }
  0x26   :  { %2254 = vmatprep.subr.bf16.mxu1 %v3658_v34 }
  0x27   :  { %582 = vmatpush1.bf16.msra.mxu0 %v2736_v29 }
  0x28   :  { %583 = vmatprep.subr.bf16.mxu0 %v2743_v30 }
  0x29   :  { %2255 = vmatpush3.bf16.msra.mxu1 %v2789_v40 }
  0x2a   :  { %281 = vmatmul.mubr.bf16.gmra.mrb[4].mxu0 %v2452_v31  ;;  %2256 = vmatprep.subr.bf16.mxu1 %v3658_v34 }
  0x2b   :  { %584 = vmatpush1.bf16.msra.mxu0 %v2752_v32  ;;  %290 = vmatprep.mubr.bf16.mxu0 %v3656_v1 }
  0x2c   :  { %585 = vmatprep.subr.bf16.mxu0 %v2758_v33  ;;  %2249 = vmatmul.mubr.bf16.gmra.mrb[4].mxu1 %v2470_v44 }
  0x2d   :  { %2257 = vmatpush3.bf16.msra.mxu1 %v2808_v43  ;;  %2268 = vmatprep.mubr.msk.bf16.mxu1 %vm2592_vm0, %v3658_v34 }
  0x2e   :  { %2258 = vmatprep.subr.bf16.mxu1 %v3658_v34 }
  0x2f   :  { %586 = vmatpush1.bf16.msra.mxu0 %v2773_v37 }
  0x30   :  { %587 = vmatprep.subr.bf16.mxu0 %v2783_v39 }
  0x31   :  { %2259 = vmatpush3.bf16.msra.mxu1 %v2831_v47 }
  0x32   :  { %291 = vmatmul.mubr.bf16.gmra.mrb[8].mxu0 %v2461_v38  ;;  %2260 = vmatprep.subr.bf16.mxu1 %v3658_v34 }
  0x33   :  { %588 = vmatpush1.bf16.msra.mxu0 %v2796_v41  ;;  %300 = vmatprep.mubr.bf16.mxu0 %v3656_v1 }
  0x34   :  { %589 = vmatprep.subr.bf16.mxu0 %v2802_v42 }
  0x35   :  { %2261 = vmatpush3.bf16.msra.mxu1 %v2852_v50 }
  0x36   :  { %2262 = vmatprep.subr.bf16.mxu1 %v3658_v34 }
  0x37   :  { %590 = vmatpush1.bf16.msra.mxu0 %v2818_v45 }
  0x38   :  { %591 = vmatprep.subr.bf16.mxu0 %v2825_v46 }
  0x39   :  { %2263 = vmatpush3.bf16.msra.mxu1 %v2872_v53 }
  0x3a   :  { %301 = vmatmul.mubr.bf16.gmra.mrb[12].mxu0 %v2470_v44  ;;  %2264 = vmatprep.subr.bf16.mxu1 %v3658_v34 }
  0x3b   :  { %592 = vmatpush1.bf16.msra.mxu0 %v2840_v48  ;;  %611 = vmatprep.mubr.bf16.mxu0 %v3656_v1 }
  0x3c   :  { %593 = vmatprep.subr.bf16.mxu0 %v2846_v49 }
  0x3d   :  { %2265 = vmatpush3.bf16.msra.mxu1 %v2883_v55 }
  0x3e   :  { %2266 = vmatprep.subr.bf16.mxu1 %v3658_v34 }
  0x3f   :  { %594 = vmatpush1.bf16.msra.mxu0 %v2859_v51 }
  0x40   :  { %693 = vmatprep.subr.bf16.mxu0 %v2713_v24 }
  0x41   :  { %2267 = vmatpush3.bf16.msra.mxu1 %v2893_v56 }
  0x42   :  { %612 = vmatmul.mubr.bf16.vlgmr.msra.gmra.mrb[16].mxu0 %v450_v54  ;;  %2272 = vmatprep.subr.bf16.mxu1 %v3658_v34 }
  0x43   :  { %694 = vmatpush1.bf16.msra.mxu0 %v2721_v26  ;;  %725 = vmatprep.mubr.bf16.mxu0 %v3656_v1 }
  0x44   :  { %695 = vmatprep.subr.bf16.mxu0 %v2727_v27  ;;  %2269 = vmatmul.mubr.bf16.vlgmr.msra.gmra.mrb[8].mxu1 %v450_v54 }
  0x45   :  { %2273 = vmatpush3.bf16.msra.mxu1 %v2764_v35  ;;  %2288 = vmatprep.mubr.msk.bf16.mxu1 %vm2592_vm0, %v3658_v34 }
  0x46   :  { %2274 = vmatprep.subr.bf16.mxu1 %v3658_v34 }
  0x47   :  { %696 = vmatpush1.bf16.msra.mxu0 %v2736_v29 }
  0x48   :  { %697 = vmatprep.subr.bf16.mxu0 %v2743_v30 }
  0x49   :  { %2275 = vmatpush3.bf16.msra.mxu1 %v2789_v40 }
  0x4a   :  { %2276 = vmatprep.subr.bf16.mxu1 %v3658_v34 }
  0x4b   :  { %698 = vmatpush1.bf16.msra.mxu0 %v2752_v32 }
  0x4c   :  { %699 = vmatprep.subr.bf16.mxu0 %v2758_v33 }
  0x4d   :  { %2277 = vmatpush3.bf16.msra.mxu1 %v2808_v43 }
  0x4e   :  { %2278 = vmatprep.subr.bf16.mxu1 %v3658_v34 }
  0x4f   :  { %700 = vmatpush1.bf16.msra.mxu0 %v2773_v37 }
  0x50   :  { %701 = vmatprep.subr.bf16.mxu0 %v2783_v39 }
  0x51   :  { %2279 = vmatpush3.bf16.msra.mxu1 %v2831_v47 }
  0x52   :  { %2280 = vmatprep.subr.bf16.mxu1 %v3658_v34 }
  0x53   :  { %702 = vmatpush1.bf16.msra.mxu0 %v2796_v41 }
  0x54   :  { %703 = vmatprep.subr.bf16.mxu0 %v2802_v42 }
  0x55   :  { %2281 = vmatpush3.bf16.msra.mxu1 %v2852_v50 }
  0x56   :  { %2282 = vmatprep.subr.bf16.mxu1 %v3658_v34 }
  0x57   :  { %704 = vmatpush1.bf16.msra.mxu0 %v2818_v45 }
  0x58   :  { %705 = vmatprep.subr.bf16.mxu0 %v2825_v46 }
  0x59   :  { %2283 = vmatpush3.bf16.msra.mxu1 %v2872_v53 }
  0x5a   :  { %2284 = vmatprep.subr.bf16.mxu1 %v3658_v34 }
  0x5b   :  { %706 = vmatpush1.bf16.msra.mxu0 %v2840_v48 }
  0x5c   :  { %707 = vmatprep.subr.bf16.mxu0 %v2846_v49 }
  0x5d   :  { %2285 = vmatpush3.bf16.msra.mxu1 %v2883_v55 }
  0x5e   :  { %2286 = vmatprep.subr.bf16.mxu1 %v3658_v34 }
  0x5f   :  { %708 = vmatpush1.bf16.msra.mxu0 %v2859_v51 }
  0x60   :  { %808 = vmatprep.subr.bf16.mxu0 %v2713_v24 }
  0x61   :  { %2287 = vmatpush3.bf16.msra.mxu1 %v2893_v56 }
  0x62   :  { %2292 = vmatprep.subr.bf16.mxu1 %v3658_v34 }
  0xf5   :  { %v272_v62 = vpop.f32.mrb[0].mxu0 }
  0xf6   :  { %v274_v0 = vpop.f32.mrb[1].mxu0 }
  0xf7   :  { %v276_v3 = vpop.f32.mrb[2].mxu0  ;;  %v2246_v14 = vpop.f32.mrb[0].mxu1 }
  0xf8   :  { %v2937_v4 = vadd.f32 %v276_v3, %v74_v63  ;;  %v278_v5 = vpop.f32.mrb[3].mxu0  ;;  %v2951_v17 = vadd.f32 %v2246_v14, %v2942_v8  ;;  %v345_v18 = vpop.f32.mrb[1].mxu1 }
  0xf9   :  { %v2940_v7 = vadd.f32 %v278_v5, %v78_v2  ;;  %v2247_v20 = vpop.f32.mrb[2].mxu1 }
  0xfa   :  { %v2956_v21 = vadd.f32 %v2247_v20, %v2942_v8  ;;  %v348_v22 = vpop.f32.mrb[3].mxu1 }
  0xfb   :  { %v2959_v23 = vadd.f32 %v348_v22, %v2942_v8 }
  0xfd   :  { %v282_v9 = vpop.f32.mrb[4].mxu0 }
  0xfe   :  { %v2944_v10 = vadd.f32 %v282_v9, %v74_v63  ;;  %v284_v11 = vpop.f32.mrb[5].mxu0 }
  0xff   :  { %v2946_v12 = vadd.f32 %v284_v11, %v78_v2  ;;  %v286_v13 = vpop.f32.mrb[6].mxu0  ;;  %v2250_v44 = vpop.f32.mrb[4].mxu1 }
 0x100   :  { %v2948_v15 = vadd.f32 %v286_v13, %v74_v63  ;;  %v288_v16 = vpop.f32.mrb[7].mxu0  ;;  %v2968_v59 = vadd.f32 %v2250_v44, %v2942_v8  ;;  %v361_v60 = vpop.f32.mrb[5].mxu1  ;;  %v273_v44 = vadd.f32 %v272_v62, %v74_v63  ;;  %v2992_v62 = vld [vmem:[%s3653_s6] ss:$0 sm:$0xff] }
 0x101   :  { %v2953_v19 = vadd.f32 %v288_v16, %v78_v2  ;;  %v2973_v3 = vadd.f32 %v361_v60, %v2942_v8  ;;  %v2251_v5 = vpop.f32.mrb[6].mxu1 }
 0x102   :  { %3660 = vst [vmem:[#allocation4_spill] sm:$0xff] %v2968_v59  ;;  %v2976_v6 = vadd.f32 %v2251_v5, %v2942_v8  ;;  %v364_v9 = vpop.f32.mrb[7].mxu1 }
 0x103   :  { %v2979_v11 = vadd.f32 %v364_v9, %v2942_v8 }
 0x104   :  { %3661 = vst [vmem:[#allocation5_spill] sm:$0xff] %v2976_v6 }
 0x105   :  { %v292_v25 = vpop.f32.mrb[8].mxu0  ;;  %3662 = vst [vmem:[#allocation6_spill] sm:$0xff] %v2979_v11 }
 0x106   :  { %v2961_v28 = vadd.f32 %v292_v25, %v74_v63  ;;  %v294_v31 = vpop.f32.mrb[9].mxu0 }
 0x107   :  { %v2963_v36 = vadd.f32 %v294_v31, %v78_v2  ;;  %v296_v38 = vpop.f32.mrb[10].mxu0 }
 0x108   :  { %v2965_v54 = vadd.f32 %v296_v38, %v74_v63  ;;  %v298_v57 = vpop.f32.mrb[11].mxu0 }
 0x109   :  { %v2970_v61 = vadd.f32 %v298_v57, %v78_v2  ;;  %v275_v57 = vadd.f32 %v274_v0, %v78_v2 }
 0x10d   :  { %v302_v13 = vpop.f32.mrb[12].mxu0 }
 0x10e   :  { %v2981_v14 = vadd.f32 %v302_v13, %v74_v63  ;;  %v304_v16 = vpop.f32.mrb[13].mxu0 }
 0x10f   :  { %v2983_v20 = vadd.f32 %v304_v16, %v78_v2  ;;  %v306_v22 = vpop.f32.mrb[14].mxu0 }
 0x110   :  { %3663 = vst [vmem:[#allocation7_spill] sm:$0xff] %v2981_v14  ;;  %v2985_v25 = vadd.f32 %v306_v22, %v74_v63  ;;  %v308_v31 = vpop.f32.mrb[15].mxu0 }
 0x111   :  { %3664 = vst [vmem:[#allocation8_spill] sm:$0xff] %v2983_v20  ;;  %v2987_v38 = vadd.f32 %v308_v31, %v78_v2 }
 0x112   :  { %3665 = vst [vmem:[#allocation9_spill] sm:$0xff] %v2985_v25 }
 0x115   :  { %v613_v60 = vpop.f32.mrb[16].mxu0 }
 0x116   :  { %v660_v5 = vadd.f32 %v613_v60, %v273_v44  ;;  %v615_v1 = vpop.f32.mrb[17].mxu0 }
 0x117   :  { %v667_v34 = vadd.f32 %v615_v1, %v275_v57  ;;  %v617_v9 = vpop.f32.mrb[18].mxu0  ;;  %v654_v14 = vpop.f32.mrb[8].mxu1 }
 0x118   :  { %v2096_v6 = vmul.f32 -1.442695, %v660_v5  ;;  %v618_v59 = vpop.f32.mrb[19].mxu0  ;;  %v2270_v16 = vpop.f32.mrb[9].mxu1  ;;  %v674_v63 = vadd.f32 %v2992_v62, %v654_v14 }
 0x119   :  { %v2097_v13 = vmul.f32 -1.442695, %v667_v34  ;;  %v657_v20 = vpop.f32.mrb[10].mxu1  ;;  %v346_v34 = vadd.f32 %v345_v18, %v2942_v8  ;;  %v2996_v57 = vpop.permute.xlu0 %441 }
 0x11a   :  { %2485 = vpow2.f32 %v2096_v6  ;;  %v2271_v22 = vpop.f32.mrb[11].mxu1  ;;  %v2593_v6 = vmov 1966171168   ;;  %vm682_vm1 = vcmp.gt.s32.totalorder %v2996_v57, 0  ;;  %vm796_vm2 = vcmp.gt.s32.totalorder %v2996_v57, 1 }
 0x11b   :  { %2487 = vpow2.f32 %v2097_v13  ;;  %v1496_v20 = vunpack.c.l.s4 %v2593_v6  ;;  %v3667_v6 = vmov 0   ;;  %vm911_vm3 = vcmp.gt.s32.totalorder %v2996_v57, 2 }
 0x11c   :  { %vm1026_vm4 = vcmp.gt.s32.totalorder %v2996_v57, 3  ;;  %vm1141_vm5 = vcmp.gt.s32.totalorder %v2996_v57, 4  ;;  %vm1256_vm6 = vcmp.gt.s32.totalorder %v2996_v57, 5  ;;  %vm1371_vm7 = vcmp.gt.s32.totalorder %v2996_v57, 6 }
 0x11d   :  { %vm1486_vm8 = vcmp.gt.s32.totalorder %v2996_v57, 7 }
 0x124   :  { %v2486_v25 = vpop.eup %2485 }
 0x125   :  { %v664_v11 = vadd.f32 1.0, %v2486_v25  ;;  %v2488_v31 = vpop.eup %2487 }
 0x126   :  { %v671_v1 = vadd.f32 1.0, %v2488_v31 }
 0x127   :  { %2489 = vrcp.f32 %v664_v11  ;;  %v1497_v11 = vunpack.c.0.s8 %v1496_v20 }
 0x128   :  { %2491 = vrcp.f32 %v671_v1 }
 0x129   :  { %v3001_v14 = vsub.s32 %v1497_v11, %v2930_v58 }
 0x131   :  { %v2490_v0 = vpop.eup %2489 }
 0x132   :  { %v675_v2 = vmul.f32 %v2490_v0, %v674_v63  ;;  %v2492_v25 = vpop.eup %2491 }
 0x133   :  { %v678_v44 = vsub.f32 1.0, %v2492_v25  ;;  %v680_v5 = vmul.f32 %v2492_v25, %v2865_v52 }
 0x134   :  { %v676_v59 = vadd.f32 %v675_v2, %v346_v34 }
 0x136   :  { %2493 = vtanh.f32 %v676_v59  ;;  %v3666_v59 = vmov 0.0  }
 0x140   :  { %v2494_v60 = vpop.eup %2493 }
 0x141   :  { %v679_v9 = vmul.f32 %v2494_v60, %v678_v44 }
 0x143   :  { %v681_v8 = vadd.f32 %v680_v5, %v679_v9 }
 0x145   :  { %v683_v18 = vsel %vm682_vm1, %v681_v8, 0.0  ;;  %v3004_v13 = vsel %vm682_vm1, %v681_v8, %v2865_v52 }
 0x146   :  { %v692_v16 = vpack.c.bf16 %v3004_v13, %v3004_v13  ;;  %v1494_v22 = vcombine.high %v683_v18, %v683_v18  ;;  %v1501_v31 = vrot.slane %v683_v18, %v3001_v14 }
 0x148   :  { %726 = vmatmul.mubr.bf16.vlgmr.msra.gmra.mrb[20].mxu0 %v692_v16  ;;  %v1508_v1 = vrot.slane %v1494_v22, %v3001_v14  ;;  %v1509_v63 = vcombine.high %v1501_v31, %v1501_v31  ;;  %v1517_v0 = vrot.slane %v1501_v31, %v3001_v14  ;;  %2112 = vst.sshfl [vmem:[%s3654_s7] sm:$0x1 pattern:$0x73625140] %v1501_v31 }
 0x149   :  { %2289 = vmatmul.mubr.bf16.vlgmr.msra.gmra.mrb[12].mxu1 %v692_v16  ;;  %809 = vmatpush1.bf16.msra.mxu0 %v2721_v26 }
 0x14a   :  { %2293 = vmatpush3.bf16.msra.mxu1 %v2764_v35  ;;  %v1510_v52 = vcombine.high %v1508_v1, %v1508_v1  ;;  %v1524_v58 = vrot.slane %v1508_v1, %v3001_v14  ;;  %v1531_v34 = vrot.slane %v1509_v63, %v3001_v14  ;;  %v1539_v2 = vcombine.high %v1517_v0, %v1517_v0 }
 0x14b   :  { %2113 = vst.sshfl [vmem:[%s3654_s7 + $0x8] sm:$0x1 pattern:$0x73625140] %v1509_v63  ;;  %810 = vmatprep.subr.bf16.mxu0 %v2727_v27  ;;  %2294 = vmatprep.subr.bf16.mxu1 %v3666_v59 }
 0x14c   :  { %2114 = vst.sshfl [vmem:[%s3654_s7 + $0x20] sm:$0x1 pattern:$0x73625140] %v1508_v1  ;;  %840 = vmatprep.mubr.bf16.mxu0 %v3667_v6  ;;  %v1538_v20 = vrot.slane %v1510_v52, %v3001_v14  ;;  %v1540_v25 = vcombine.high %v1524_v58, %v1524_v58  ;;  %v1541_v11 = vcombine.high %v1531_v34, %v1531_v34  ;;  %1553 = vst [vmem:[%s3654_s7 + $0x10] sm:$0x1] %v1539_v2 }
 0x14d   :  { %2115 = vst.sshfl [vmem:[%s3654_s7 + $0x28] sm:$0x1 pattern:$0x73625140] %v1510_v52  ;;  %2308 = vmatprep.mubr.msk.bf16.mxu1 %vm2592_vm0, %v3666_v59  ;;  %811 = vmatpush1.bf16.msra.mxu0 %v2736_v29 }
 0x14e   :  { %2295 = vmatpush3.bf16.msra.mxu1 %v2789_v40  ;;  %v1542_v44 = vcombine.high %v1538_v20, %v1538_v20  ;;  %1554 = vst [vmem:[%s3654_s7 + $0x18] sm:$0x1] %v1541_v11  ;;  %1557 = vst [vmem:[%s3654_s7 + $0x30] sm:$0x1] %v1540_v25  ;;  %812 = vmatprep.subr.bf16.mxu0 %v2743_v30 }
 0x14f   :  { %2296 = vmatprep.subr.bf16.mxu1 %v3666_v59 }
 0x150   :  { %1558 = vst [vmem:[%s3654_s7 + $0x38] sm:$0x1] %v1542_v44 }
 0x151   :  { %813 = vmatpush1.bf16.msra.mxu0 %v2752_v32 }
 0x152   :  { %2297 = vmatpush3.bf16.msra.mxu1 %v2808_v43  ;;  %814 = vmatprep.subr.bf16.mxu0 %v2758_v33 }
 0x153   :  { %2298 = vmatprep.subr.bf16.mxu1 %v3666_v59 }
 0x155   :  { %815 = vmatpush1.bf16.msra.mxu0 %v2773_v37 }
 0x156   :  { %2299 = vmatpush3.bf16.msra.mxu1 %v2831_v47  ;;  %816 = vmatprep.subr.bf16.mxu0 %v2783_v39 }
 0x157   :  { %2300 = vmatprep.subr.bf16.mxu1 %v3666_v59 }
 0x159   :  { %817 = vmatpush1.bf16.msra.mxu0 %v2796_v41 }
 0x15a   :  { %2301 = vmatpush3.bf16.msra.mxu1 %v2852_v50  ;;  %818 = vmatprep.subr.bf16.mxu0 %v2802_v42 }
 0x15b   :  { %2302 = vmatprep.subr.bf16.mxu1 %v3666_v59 }
 0x15d   :  { %819 = vmatpush1.bf16.msra.mxu0 %v2818_v45 }
 0x15e   :  { %2303 = vmatpush3.bf16.msra.mxu1 %v2872_v53  ;;  %820 = vmatprep.subr.bf16.mxu0 %v2825_v46 }
 0x15f   :  { %2304 = vmatprep.subr.bf16.mxu1 %v3666_v59 }
 0x161   :  { %821 = vmatpush1.bf16.msra.mxu0 %v2840_v48 }
 0x162   :  { %2305 = vmatpush3.bf16.msra.mxu1 %v2883_v55  ;;  %822 = vmatprep.subr.bf16.mxu0 %v2846_v49 }
 0x163   :  { %2306 = vmatprep.subr.bf16.mxu1 %v3666_v59 }
 0x165   :  { %823 = vmatpush1.bf16.msra.mxu0 %v2859_v51 }
 0x166   :  { %2307 = vmatpush3.bf16.msra.mxu1 %v2893_v56  ;;  %923 = vmatprep.subr.bf16.mxu0 %v2713_v24 }
 0x167   :  { %2312 = vmatprep.subr.bf16.mxu1 %v3666_v59 }
 0x21b   :  { %v727_v60 = vpop.f32.mrb[20].mxu0 }
 0x21c   :  { %v768_v5 = vpop.f32.mrb[12].mxu1  ;;  %v774_v9 = vadd.f32 %v727_v60, %v2937_v4  ;;  %v729_v8 = vpop.f32.mrb[21].mxu0 }
 0x21d   :  { %v2290_v18 = vpop.f32.mrb[13].mxu1  ;;  %v781_v16 = vadd.f32 %v729_v8, %v2940_v7  ;;  %v731_v22 = vpop.f32.mrb[22].mxu0  ;;  %v788_v25 = vadd.f32 %v2992_v62, %v768_v5 }
 0x21e   :  { %v771_v31 = vpop.f32.mrb[14].mxu1  ;;  %v2098_v1 = vmul.f32 -1.442695, %v774_v9  ;;  %v732_v63 = vpop.f32.mrb[23].mxu0 }
 0x21f   :  { %v2291_v0 = vpop.f32.mrb[15].mxu1  ;;  %v2099_v52 = vmul.f32 -1.442695, %v781_v16 }
 0x220   :  { %2495 = vpow2.f32 %v2098_v1 }
 0x221   :  { %2497 = vpow2.f32 %v2099_v52 }
 0x22a   :  { %v2496_v58 = vpop.eup %2495 }
 0x22b   :  { %v778_v34 = vadd.f32 1.0, %v2496_v58  ;;  %v2498_v2 = vpop.eup %2497 }
 0x22c   :  { %v785_v20 = vadd.f32 1.0, %v2498_v2 }
 0x22d   :  { %2499 = vrcp.f32 %v778_v34 }
 0x22e   :  { %2501 = vrcp.f32 %v785_v20 }
 0x237   :  { %v2500_v4 = vpop.eup %2499 }
 0x238   :  { %v789_v11 = vmul.f32 %v2500_v4, %v788_v25  ;;  %v2502_v44 = vpop.eup %2501 }
 0x239   :  { %v792_v60 = vsub.f32 1.0, %v2502_v44  ;;  %v794_v8 = vmul.f32 %v2502_v44, %v3004_v13 }
 0x23a   :  { %v790_v7 = vadd.f32 %v789_v11, %v2959_v23 }
 0x23c   :  { %2503 = vtanh.f32 %v790_v7 }
 0x246   :  { %v2504_v9 = vpop.eup %2503 }
 0x247   :  { %v793_v18 = vmul.f32 %v2504_v9, %v792_v60 }
 0x249   :  { %v795_v16 = vadd.f32 %v794_v8, %v793_v18 }
 0x24b   :  { %v797_v22 = vsel %vm796_vm2, %v795_v16, 0.0  ;;  %v3080_v31 = vsel %vm796_vm2, %v795_v16, %v3004_v13 }
 0x24c   :  { %v807_v5 = vpack.c.bf16 %v3080_v31, %v3080_v31  ;;  %v1561_v1 = vcombine.high %v797_v22, %v797_v22  ;;  %v1568_v23 = vrot.slane %v797_v22, %v3001_v14 }
 0x24e   :  { %841 = vmatmul.mubr.bf16.vlgmr.msra.gmra.mrb[24].mxu0 %v807_v5  ;;  %v1575_v63 = vrot.slane %v1561_v1, %v3001_v14  ;;  %v1576_v0 = vcombine.high %v1568_v23, %v1568_v23  ;;  %v1584_v52 = vrot.slane %v1568_v23, %v3001_v14  ;;  %2116 = vst.sshfl [vmem:[%s3654_s7 + $0x1] sm:$0x1 pattern:$0x73625140] %v1568_v23 }
 0x24f   :  { %2309 = vmatmul.mubr.bf16.vlgmr.msra.gmra.mrb[16].mxu1 %v807_v5  ;;  %924 = vmatpush1.bf16.msra.mxu0 %v2721_v26 }
 0x250   :  { %2313 = vmatpush3.bf16.msra.mxu1 %v2764_v35  ;;  %v1577_v13 = vcombine.high %v1575_v63, %v1575_v63  ;;  %v1591_v58 = vrot.slane %v1575_v63, %v3001_v14  ;;  %v1598_v34 = vrot.slane %v1576_v0, %v3001_v14  ;;  %v1606_v2 = vcombine.high %v1584_v52, %v1584_v52 }
 0x251   :  { %2117 = vst.sshfl [vmem:[%s3654_s7 + $0x9] sm:$0x1 pattern:$0x73625140] %v1576_v0  ;;  %925 = vmatprep.subr.bf16.mxu0 %v2727_v27  ;;  %2314 = vmatprep.subr.bf16.mxu1 %v3666_v59 }
 0x252   :  { %2118 = vst.sshfl [vmem:[%s3654_s7 + $0x21] sm:$0x1 pattern:$0x73625140] %v1575_v63  ;;  %955 = vmatprep.mubr.bf16.mxu0 %v3667_v6  ;;  %v1605_v20 = vrot.slane %v1577_v13, %v3001_v14  ;;  %v1607_v25 = vcombine.high %v1591_v58, %v1591_v58  ;;  %v1608_v4 = vcombine.high %v1598_v34, %v1598_v34  ;;  %1620 = vst [vmem:[%s3654_s7 + $0x11] sm:$0x1] %v1606_v2 }
 0x253   :  { %2119 = vst.sshfl [vmem:[%s3654_s7 + $0x29] sm:$0x1 pattern:$0x73625140] %v1577_v13  ;;  %2328 = vmatprep.mubr.msk.bf16.mxu1 %vm2592_vm0, %v3666_v59  ;;  %926 = vmatpush1.bf16.msra.mxu0 %v2736_v29 }
 0x254   :  { %2315 = vmatpush3.bf16.msra.mxu1 %v2789_v40  ;;  %v1609_v11 = vcombine.high %v1605_v20, %v1605_v20  ;;  %1621 = vst [vmem:[%s3654_s7 + $0x19] sm:$0x1] %v1608_v4  ;;  %1624 = vst [vmem:[%s3654_s7 + $0x31] sm:$0x1] %v1607_v25  ;;  %927 = vmatprep.subr.bf16.mxu0 %v2743_v30 }
 0x255   :  { %2316 = vmatprep.subr.bf16.mxu1 %v3666_v59 }
 0x256   :  { %1625 = vst [vmem:[%s3654_s7 + $0x39] sm:$0x1] %v1609_v11 }
 0x257   :  { %928 = vmatpush1.bf16.msra.mxu0 %v2752_v32 }
 0x258   :  { %2317 = vmatpush3.bf16.msra.mxu1 %v2808_v43  ;;  %929 = vmatprep.subr.bf16.mxu0 %v2758_v33 }
 0x259   :  { %2318 = vmatprep.subr.bf16.mxu1 %v3666_v59 }
 0x25b   :  { %930 = vmatpush1.bf16.msra.mxu0 %v2773_v37 }
 0x25c   :  { %2319 = vmatpush3.bf16.msra.mxu1 %v2831_v47  ;;  %931 = vmatprep.subr.bf16.mxu0 %v2783_v39 }
 0x25d   :  { %2320 = vmatprep.subr.bf16.mxu1 %v3666_v59 }
 0x25f   :  { %932 = vmatpush1.bf16.msra.mxu0 %v2796_v41 }
 0x260   :  { %2321 = vmatpush3.bf16.msra.mxu1 %v2852_v50  ;;  %933 = vmatprep.subr.bf16.mxu0 %v2802_v42 }
 0x261   :  { %2322 = vmatprep.subr.bf16.mxu1 %v3666_v59 }
 0x263   :  { %934 = vmatpush1.bf16.msra.mxu0 %v2818_v45 }
 0x264   :  { %2323 = vmatpush3.bf16.msra.mxu1 %v2872_v53  ;;  %935 = vmatprep.subr.bf16.mxu0 %v2825_v46 }
 0x265   :  { %2324 = vmatprep.subr.bf16.mxu1 %v3666_v59 }
 0x267   :  { %936 = vmatpush1.bf16.msra.mxu0 %v2840_v48 }
 0x268   :  { %2325 = vmatpush3.bf16.msra.mxu1 %v2883_v55  ;;  %937 = vmatprep.subr.bf16.mxu0 %v2846_v49 }
 0x269   :  { %2326 = vmatprep.subr.bf16.mxu1 %v3666_v59 }
 0x26b   :  { %938 = vmatpush1.bf16.msra.mxu0 %v2859_v51 }
 0x26c   :  { %2327 = vmatpush3.bf16.msra.mxu1 %v2893_v56  ;;  %1038 = vmatprep.subr.bf16.mxu0 %v2713_v24 }
 0x26d   :  { %2332 = vmatprep.subr.bf16.mxu1 %v3666_v59 }
 0x321   :  { %v842_v7 = vpop.f32.mrb[24].mxu0 }
 0x322   :  { %v883_v44 = vpop.f32.mrb[16].mxu1  ;;  %v889_v60 = vadd.f32 %v842_v7, %v2944_v10  ;;  %v844_v9 = vpop.f32.mrb[25].mxu0 }
 0x323   :  { %v2310_v8 = vpop.f32.mrb[17].mxu1  ;;  %v896_v18 = vadd.f32 %v844_v9, %v2946_v12  ;;  %v846_v16 = vpop.f32.mrb[26].mxu0  ;;  %v903_v34 = vadd.f32 %v2992_v62, %v883_v44 }
 0x324   :  { %v886_v22 = vpop.f32.mrb[18].mxu1  ;;  %v2100_v5 = vmul.f32 -1.442695, %v889_v60  ;;  %v847_v1 = vpop.f32.mrb[27].mxu0 }
 0x325   :  { %v2311_v23 = vpop.f32.mrb[19].mxu1  ;;  %v2101_v63 = vmul.f32 -1.442695, %v896_v18 }
 0x326   :  { %2505 = vpow2.f32 %v2100_v5 }
 0x327   :  { %2507 = vpow2.f32 %v2101_v63 }
 0x330   :  { %v2506_v0 = vpop.eup %2505 }
 0x331   :  { %v893_v52 = vadd.f32 1.0, %v2506_v0  ;;  %v2508_v13 = vpop.eup %2507 }
 0x332   :  { %v900_v58 = vadd.f32 1.0, %v2508_v13 }
 0x333   :  { %2509 = vrcp.f32 %v893_v52 }
 0x334   :  { %2511 = vrcp.f32 %v900_v58 }
 0x33d   :  { %v2510_v10 = vpop.eup %2509 }
 0x33e   :  { %v904_v2 = vmul.f32 %v2510_v10, %v903_v34  ;;  %v2512_v20 = vpop.eup %2511 }
 0x33f   :  { %v907_v25 = vsub.f32 1.0, %v2512_v20  ;;  %v909_v11 = vmul.f32 %v2512_v20, %v3080_v31 }
 0x340   :  { %v905_v12 = vadd.f32 %v904_v2, %v2951_v17 }
 0x342   :  { %2513 = vtanh.f32 %v905_v12 }
 0x34c   :  { %v2514_v4 = vpop.eup %2513 }
 0x34d   :  { %v908_v7 = vmul.f32 %v2514_v4, %v907_v25 }
 0x34f   :  { %v910_v60 = vadd.f32 %v909_v11, %v908_v7 }
 0x351   :  { %v912_v9 = vsel %vm911_vm3, %v910_v60, 0.0  ;;  %v3156_v8 = vsel %vm911_vm3, %v910_v60, %v3080_v31 }
 0x352   :  { %v922_v44 = vpack.c.bf16 %v3156_v8, %v3156_v8  ;;  %v1628_v18 = vcombine.high %v912_v9, %v912_v9  ;;  %v1635_v17 = vrot.slane %v912_v9, %v3001_v14 }
 0x354   :  { %956 = vmatmul.mubr.bf16.vlgmr.msra.gmra.mrb[28].mxu0 %v922_v44  ;;  %v1642_v16 = vrot.slane %v1628_v18, %v3001_v14  ;;  %v1643_v22 = vcombine.high %v1635_v17, %v1635_v17  ;;  %v1651_v5 = vrot.slane %v1635_v17, %v3001_v14  ;;  %2120 = vst.sshfl [vmem:[%s3654_s7 + $0x2] sm:$0x1 pattern:$0x73625140] %v1635_v17 }
 0x355   :  { %2329 = vmatmul.mubr.bf16.vlgmr.msra.gmra.mrb[20].mxu1 %v922_v44  ;;  %1039 = vmatpush1.bf16.msra.mxu0 %v2721_v26 }
 0x356   :  { %2333 = vmatpush3.bf16.msra.mxu1 %v2764_v35  ;;  %v1644_v31 = vcombine.high %v1642_v16, %v1642_v16  ;;  %v1658_v1 = vrot.slane %v1642_v16, %v3001_v14  ;;  %v1665_v23 = vrot.slane %v1643_v22, %v3001_v14  ;;  %v1673_v63 = vcombine.high %v1651_v5, %v1651_v5 }
 0x357   :  { %2121 = vst.sshfl [vmem:[%s3654_s7 + $0xa] sm:$0x1 pattern:$0x73625140] %v1643_v22  ;;  %1040 = vmatprep.subr.bf16.mxu0 %v2727_v27  ;;  %2334 = vmatprep.subr.bf16.mxu1 %v3666_v59 }
 0x358   :  { %2122 = vst.sshfl [vmem:[%s3654_s7 + $0x22] sm:$0x1 pattern:$0x73625140] %v1642_v16  ;;  %1070 = vmatprep.mubr.bf16.mxu0 %v3667_v6  ;;  %v1672_v26 = vrot.slane %v1644_v31, %v3001_v14  ;;  %v1674_v0 = vcombine.high %v1658_v1, %v1658_v1  ;;  %v1675_v52 = vcombine.high %v1665_v23, %v1665_v23  ;;  %1687 = vst [vmem:[%s3654_s7 + $0x12] sm:$0x1] %v1673_v63 }
 0x359   :  { %2123 = vst.sshfl [vmem:[%s3654_s7 + $0x2a] sm:$0x1 pattern:$0x73625140] %v1644_v31  ;;  %2348 = vmatprep.mubr.msk.bf16.mxu1 %vm2592_vm0, %v3666_v59  ;;  %1041 = vmatpush1.bf16.msra.mxu0 %v2736_v29 }
 0x35a   :  { %2335 = vmatpush3.bf16.msra.mxu1 %v2789_v40  ;;  %v1676_v27 = vcombine.high %v1672_v26, %v1672_v26  ;;  %1688 = vst [vmem:[%s3654_s7 + $0x1a] sm:$0x1] %v1675_v52  ;;  %1691 = vst [vmem:[%s3654_s7 + $0x32] sm:$0x1] %v1674_v0  ;;  %1042 = vmatprep.subr.bf16.mxu0 %v2743_v30 }
 0x35b   :  { %2336 = vmatprep.subr.bf16.mxu1 %v3666_v59 }
 0x35c   :  { %1692 = vst [vmem:[%s3654_s7 + $0x3a] sm:$0x1] %v1676_v27 }
 0x35d   :  { %1043 = vmatpush1.bf16.msra.mxu0 %v2752_v32 }
 0x35e   :  { %2337 = vmatpush3.bf16.msra.mxu1 %v2808_v43  ;;  %1044 = vmatprep.subr.bf16.mxu0 %v2758_v33 }
 0x35f   :  { %2338 = vmatprep.subr.bf16.mxu1 %v3666_v59 }
 0x361   :  { %1045 = vmatpush1.bf16.msra.mxu0 %v2773_v37 }
 0x362   :  { %2339 = vmatpush3.bf16.msra.mxu1 %v2831_v47  ;;  %1046 = vmatprep.subr.bf16.mxu0 %v2783_v39 }
 0x363   :  { %2340 = vmatprep.subr.bf16.mxu1 %v3666_v59 }
 0x365   :  { %1047 = vmatpush1.bf16.msra.mxu0 %v2796_v41 }
 0x366   :  { %2341 = vmatpush3.bf16.msra.mxu1 %v2852_v50  ;;  %1048 = vmatprep.subr.bf16.mxu0 %v2802_v42 }
 0x367   :  { %2342 = vmatprep.subr.bf16.mxu1 %v3666_v59 }
 0x369   :  { %1049 = vmatpush1.bf16.msra.mxu0 %v2818_v45 }
 0x36a   :  { %2343 = vmatpush3.bf16.msra.mxu1 %v2872_v53  ;;  %1050 = vmatprep.subr.bf16.mxu0 %v2825_v46 }
 0x36b   :  { %2344 = vmatprep.subr.bf16.mxu1 %v3666_v59 }
 0x36d   :  { %1051 = vmatpush1.bf16.msra.mxu0 %v2840_v48 }
 0x36e   :  { %2345 = vmatpush3.bf16.msra.mxu1 %v2883_v55  ;;  %1052 = vmatprep.subr.bf16.mxu0 %v2846_v49 }
 0x36f   :  { %2346 = vmatprep.subr.bf16.mxu1 %v3666_v59 }
 0x371   :  { %1053 = vmatpush1.bf16.msra.mxu0 %v2859_v51 }
 0x372   :  { %2347 = vmatpush3.bf16.msra.mxu1 %v2893_v56  ;;  %1153 = vmatprep.subr.bf16.mxu0 %v2713_v24 }
 0x373   :  { %2352 = vmatprep.subr.bf16.mxu1 %v3666_v59 }
 0x427   :  { %v957_v29 = vpop.f32.mrb[28].mxu0 }
 0x428   :  { %v998_v30 = vpop.f32.mrb[20].mxu1  ;;  %v1004_v32 = vadd.f32 %v957_v29, %v2948_v15  ;;  %v959_v33 = vpop.f32.mrb[29].mxu0 }
 0x429   :  { %v2330_v13 = vpop.f32.mrb[21].mxu1  ;;  %v1011_v58 = vadd.f32 %v959_v33, %v2953_v19  ;;  %v961_v34 = vpop.f32.mrb[30].mxu0  ;;  %v1018_v60 = vadd.f32 %v2992_v62, %v998_v30  ;;  %v3260_v33 = vld [vmem:[%s3649_s4 + $0x1c] ss:$12 sps:$4 sm:$0xff]  }
 0x42a   :  { %v1001_v10 = vpop.f32.mrb[22].mxu1  ;;  %v2102_v2 = vmul.f32 -1.442695, %v1004_v32  ;;  %v962_v12 = vpop.f32.mrb[31].mxu0  ;;  %v3277_v34 = vld [vmem:[%s3649_s4 + $0x18] ss:$12 sps:$4 sm:$0xff]  }
 0x42b   :  { %v2331_v20 = vpop.f32.mrb[23].mxu1  ;;  %v2103_v25 = vmul.f32 -1.442695, %v1011_v58  ;;  %v3307_v12 = vld [vmem:[%s3649_s4 + $0x4c] ss:$12 sps:$4 sm:$0xff]  }
 0x42c   :  { %2515 = vpow2.f32 %v2102_v2  ;;  %v3290_v2 = vld [vmem:[%s3649_s4 + $0x34] ss:$12 sps:$4 sm:$0xff]  }
 0x42d   :  { %2517 = vpow2.f32 %v2103_v25 }
 0x436   :  { %v2516_v4 = vpop.eup %2515 }
 0x437   :  { %v1008_v24 = vadd.f32 1.0, %v2516_v4  ;;  %v2518_v11 = vpop.eup %2517 }
 0x438   :  { %v1015_v7 = vadd.f32 1.0, %v2518_v11 }
 0x439   :  { %2519 = vrcp.f32 %v1008_v24 }
 0x43a   :  { %2521 = vrcp.f32 %v1015_v7 }
 0x443   :  { %v2520_v15 = vpop.eup %2519 }
 0x444   :  { %v1019_v9 = vmul.f32 %v2520_v15, %v1018_v60  ;;  %v2522_v44 = vpop.eup %2521 }
 0x445   :  { %v1022_v18 = vsub.f32 1.0, %v2522_v44  ;;  %v1024_v16 = vmul.f32 %v2522_v44, %v3156_v8 }
 0x446   :  { %v1020_v19 = vadd.f32 %v1019_v9, %v2956_v21 }
 0x448   :  { %2523 = vtanh.f32 %v1020_v19 }
 0x452   :  { %v2524_v17 = vpop.eup %2523 }
 0x453   :  { %v1023_v22 = vmul.f32 %v2524_v17, %v1022_v18 }
 0x455   :  { %v1025_v5 = vadd.f32 %v1024_v16, %v1023_v22 }
 0x457   :  { %v1027_v31 = vsel %vm1026_vm4, %v1025_v5, 0.0  ;;  %v3232_v1 = vsel %vm1026_vm4, %v1025_v5, %v3156_v8  ;;  %v3245_v8 = vld [vmem:[%s3649_s4] ss:$12 sps:$4 sm:$0xff]  }
 0x458   :  { %v1037_v23 = vpack.c.bf16 %v3232_v1, %v3232_v1  ;;  %v1695_v63 = vcombine.high %v1027_v31, %v1027_v31  ;;  %v1702_v21 = vrot.slane %v1027_v31, %v3001_v14 }
 0x45a   :  { %1071 = vmatmul.mubr.bf16.vlgmr.msra.gmra.mrb[32].mxu0 %v1037_v23  ;;  %v1709_v26 = vrot.slane %v1695_v63, %v3001_v14  ;;  %v1710_v0 = vcombine.high %v1702_v21, %v1702_v21  ;;  %v1718_v52 = vrot.slane %v1702_v21, %v3001_v14  ;;  %2124 = vst.sshfl [vmem:[%s3654_s7 + $0x3] sm:$0x1 pattern:$0x73625140] %v1702_v21 }
 0x45b   :  { %2349 = vmatmul.mubr.bf16.vlgmr.msra.gmra.mrb[24].mxu1 %v1037_v23  ;;  %1154 = vmatpush1.bf16.msra.mxu0 %v3245_v8 }
 0x45c   :  { %2353 = vmatpush3.bf16.msra.mxu1 %v2764_v35  ;;  %v1711_v27 = vcombine.high %v1709_v26, %v1709_v26  ;;  %v1725_v29 = vrot.slane %v1709_v26, %v3001_v14  ;;  %v1732_v30 = vrot.slane %v1710_v0, %v3001_v14  ;;  %v1740_v32 = vcombine.high %v1718_v52, %v1718_v52 }
 0x45d   :  { %2125 = vst.sshfl [vmem:[%s3654_s7 + $0xb] sm:$0x1 pattern:$0x73625140] %v1710_v0  ;;  %1155 = vmatprep.subr.bf16.mxu0 %v3260_v33  ;;  %2354 = vmatprep.subr.bf16.mxu1 %v3666_v59 }
 0x45e   :  { %2126 = vst.sshfl [vmem:[%s3654_s7 + $0x23] sm:$0x1 pattern:$0x73625140] %v1709_v26  ;;  %1185 = vmatprep.mubr.bf16.mxu0 %v3667_v6  ;;  %v1739_v35 = vrot.slane %v1711_v27, %v3001_v14  ;;  %v1741_v13 = vcombine.high %v1725_v29, %v1725_v29  ;;  %v1742_v58 = vcombine.high %v1732_v30, %v1732_v30  ;;  %1754 = vst [vmem:[%s3654_s7 + $0x13] sm:$0x1] %v1740_v32 }
 0x45f   :  { %2127 = vst.sshfl [vmem:[%s3654_s7 + $0x2b] sm:$0x1 pattern:$0x73625140] %v1711_v27  ;;  %2368 = vmatprep.mubr.msk.bf16.mxu1 %vm2592_vm0, %v3666_v59  ;;  %1156 = vmatpush1.bf16.msra.mxu0 %v3277_v34  ;;  %v3384_v29 = vld [vmem:[%s3649_s4 + $0x20] ss:$12 sps:$4 sm:$0xff]  }
 0x460   :  { %2355 = vmatpush3.bf16.msra.mxu1 %v2789_v40  ;;  %v1743_v10 = vcombine.high %v1739_v35, %v1739_v35  ;;  %1755 = vst [vmem:[%s3654_s7 + $0x1b] sm:$0x1] %v1742_v58  ;;  %1758 = vst [vmem:[%s3654_s7 + $0x33] sm:$0x1] %v1741_v13  ;;  %1157 = vmatprep.subr.bf16.mxu0 %v3290_v2  ;;  %v3300_v40 = vld [vmem:[%s3649_s4 + $0x30] ss:$12 sps:$4 sm:$0xff]  }
 0x461   :  { %2356 = vmatprep.subr.bf16.mxu1 %v3666_v59  ;;  %v3402_v32 = vld [vmem:[%s3649_s4 + $0x38] ss:$12 sps:$4 sm:$0xff]   ;;  %v3410_v35 = vld [vmem:[%s3649_s4 + $0x48] ss:$12 sps:$4 sm:$0xff]   ;;  %v3416_v13 = vld [vmem:[%s3649_s4 + $0x50] ss:$12 sps:$4 sm:$0xff]  }
 0x462   :  { %1759 = vst [vmem:[%s3654_s7 + $0x3b] sm:$0x1] %v1743_v10  ;;  %v3422_v58 = vld [vmem:[%s3649_s4 + $0x64] ss:$12 sps:$4 sm:$0xff]   ;;  %v3429_v10 = vld [vmem:[%s3649_s4 + $0x60] ss:$12 sps:$4 sm:$0xff]  }
 0x463   :  { %1158 = vmatpush1.bf16.msra.mxu0 %v3300_v40 }
 0x464   :  { %2357 = vmatpush3.bf16.msra.mxu1 %v2808_v43  ;;  %1159 = vmatprep.subr.bf16.mxu0 %v3307_v12 }
 0x465   :  { %2358 = vmatprep.subr.bf16.mxu1 %v3666_v59 }
 0x467   :  { %1160 = vmatpush1.bf16.msra.mxu0 %v2773_v37  ;;  %v3332_v37 = vld [vmem:[%s3649_s4 + $0x4] ss:$12 sps:$4 sm:$0xff]  }
 0x468   :  { %2359 = vmatpush3.bf16.msra.mxu1 %v2831_v47  ;;  %1161 = vmatprep.subr.bf16.mxu0 %v2783_v39 }
 0x469   :  { %2360 = vmatprep.subr.bf16.mxu1 %v3666_v59 }
 0x46b   :  { %1162 = vmatpush1.bf16.msra.mxu0 %v2796_v41 }
 0x46c   :  { %2361 = vmatpush3.bf16.msra.mxu1 %v2852_v50  ;;  %1163 = vmatprep.subr.bf16.mxu0 %v2802_v42 }
 0x46d   :  { %2362 = vmatprep.subr.bf16.mxu1 %v3666_v59 }
 0x46f   :  { %1164 = vmatpush1.bf16.msra.mxu0 %v2818_v45 }
 0x470   :  { %2363 = vmatpush3.bf16.msra.mxu1 %v2872_v53  ;;  %1165 = vmatprep.subr.bf16.mxu0 %v2825_v46 }
 0x471   :  { %2364 = vmatprep.subr.bf16.mxu1 %v3666_v59 }
 0x473   :  { %1166 = vmatpush1.bf16.msra.mxu0 %v2840_v48 }
 0x474   :  { %2365 = vmatpush3.bf16.msra.mxu1 %v2883_v55  ;;  %1167 = vmatprep.subr.bf16.mxu0 %v2846_v49 }
 0x475   :  { %2366 = vmatprep.subr.bf16.mxu1 %v3666_v59 }
 0x477   :  { %1168 = vmatpush1.bf16.msra.mxu0 %v2859_v51 }
 0x478   :  { %2367 = vmatpush3.bf16.msra.mxu1 %v2893_v56  ;;  %1268 = vmatprep.subr.bf16.mxu0 %v3332_v37 }
 0x479   :  { %2372 = vmatprep.subr.bf16.mxu1 %v3666_v59 }
 0x52d   :  { %v1072_v39 = vpop.f32.mrb[32].mxu0 }
 0x52e   :  { %v1113_v41 = vpop.f32.mrb[24].mxu1  ;;  %v1119_v42 = vadd.f32 %v1072_v39, %v2961_v28  ;;  %v1074_v43 = vpop.f32.mrb[33].mxu0  ;;  %v3435_v39 = vld [vmem:[%s3649_s4 + $0x68] ss:$12 sps:$4 sm:$0xff]  }
 0x52f   :  { %v2350_v45 = vpop.f32.mrb[25].mxu1  ;;  %v1126_v46 = vadd.f32 %v1074_v43, %v2963_v36  ;;  %v1076_v47 = vpop.f32.mrb[34].mxu0  ;;  %v1133_v4 = vadd.f32 %v2992_v62, %v1113_v41  ;;  %v3441_v41 = vld [vmem:[%s3649_s4 + $0x7c] ss:$12 sps:$4 sm:$0xff]   ;;  %v3454_v43 = vld [vmem:[%s3649_s4 + $0x80] ss:$12 sps:$4 sm:$0xff]  }
 0x530   :  { %v1116_v48 = vpop.f32.mrb[26].mxu1  ;;  %v2104_v49 = vmul.f32 -1.442695, %v1119_v42  ;;  %v1077_v50 = vpop.f32.mrb[35].mxu0  ;;  %v3448_v42 = vld [vmem:[%s3649_s4 + $0x78] ss:$12 sps:$4 sm:$0xff]  }
 0x531   :  { %v2351_v51 = vpop.f32.mrb[27].mxu1  ;;  %v2105_v53 = vmul.f32 -1.442695, %v1126_v46  ;;  %v3460_v45 = vld [vmem:[%s3649_s4 + $0x94] ss:$12 sps:$4 sm:$0xff]  }
 0x532   :  { %2525 = vpow2.f32 %v2104_v49  ;;  %v3467_v46 = vld [vmem:[%s3649_s4 + $0x90] ss:$12 sps:$4 sm:$0xff]   ;;  %v3473_v47 = vld [vmem:[%s3649_s4 + $0x98] ss:$12 sps:$4 sm:$0xff]   ;;  %v3486_v49 = vld [vmem:[%s3649_s4 + $0xa8] ss:$12 sps:$4 sm:$0xff]  }
 0x533   :  { %2527 = vpow2.f32 %v2105_v53  ;;  %v3479_v48 = vld [vmem:[%s3649_s4 + $0xac] ss:$12 sps:$4 sm:$0xff]   ;;  %v3492_v50 = vld [vmem:[%s3649_s4 + $0xb0] ss:$12 sps:$4 sm:$0xff]  }
 0x53c   :  { %v2526_v55 = vpop.eup %2525 }
 0x53d   :  { %v1123_v56 = vadd.f32 1.0, %v2526_v55  ;;  %v2528_v20 = vpop.eup %2527 }
 0x53e   :  { %v1130_v25 = vadd.f32 1.0, %v2528_v20 }
 0x53f   :  { %2529 = vrcp.f32 %v1123_v56 }
 0x540   :  { %2531 = vrcp.f32 %v1130_v25 }
 0x549   :  { %v2530_v28 = vpop.eup %2529 }
 0x54a   :  { %v1134_v24 = vmul.f32 %v2530_v28, %v1133_v4  ;;  %v2532_v11 = vpop.eup %2531 }
 0x54b   :  { %v1137_v7 = vsub.f32 1.0, %v2532_v11  ;;  %v1139_v15 = vmul.f32 %v2532_v11, %v3232_v1 }
 0x54c   :  { %v1135_v36 = vadd.f32 %v1134_v24, %v2973_v3 }
 0x54e   :  { %2533 = vtanh.f32 %v1135_v36 }
 0x558   :  { %v2534_v60 = vpop.eup %2533 }
 0x559   :  { %v1138_v9 = vmul.f32 %v2534_v60, %v1137_v7 }
 0x55b   :  { %v1140_v19 = vadd.f32 %v1139_v15, %v1138_v9 }
 0x55d   :  { %v1142_v44 = vsel %vm1141_vm5, %v1140_v19, 0.0  ;;  %v3343_v18 = vsel %vm1141_vm5, %v1140_v19, %v3232_v1  ;;  %v3357_v1 = vld [vmem:[%s3649_s4 + $0x8] ss:$12 sps:$4 sm:$0xff]  }
 0x55e   :  { %v1152_v17 = vpack.c.bf16 %v3343_v18, %v3343_v18  ;;  %v1762_v16 = vcombine.high %v1142_v44, %v1142_v44  ;;  %v1769_v3 = vrot.slane %v1142_v44, %v3001_v14 }
 0x560   :  { %1186 = vmatmul.mubr.bf16.vlgmr.msra.gmra.mrb[36].mxu0 %v1152_v17  ;;  %v1776_v22 = vrot.slane %v1762_v16, %v3001_v14  ;;  %v1777_v5 = vcombine.high %v1769_v3, %v1769_v3  ;;  %v1785_v31 = vrot.slane %v1769_v3, %v3001_v14  ;;  %2128 = vst.sshfl [vmem:[%s3654_s7 + $0x4] sm:$0x1 pattern:$0x73625140] %v1769_v3 }
 0x561   :  { %2369 = vmatmul.mubr.bf16.vlgmr.msra.gmra.mrb[28].mxu1 %v1152_v17  ;;  %1269 = vmatpush1.bf16.msra.mxu0 %v3245_v8  ;;  %v3668_v17 = vld [vmem:[#allocation6_spill] sm:$0xff] }
 0x562   :  { %2373 = vmatpush3.bf16.msra.mxu1 %v3357_v1  ;;  %v1778_v23 = vcombine.high %v1776_v22, %v1776_v22  ;;  %v1792_v63 = vrot.slane %v1776_v22, %v3001_v14  ;;  %v1799_v21 = vrot.slane %v1777_v5, %v3001_v14  ;;  %v1807_v26 = vcombine.high %v1785_v31, %v1785_v31 }
 0x563   :  { %2129 = vst.sshfl [vmem:[%s3654_s7 + $0xc] sm:$0x1 pattern:$0x73625140] %v1777_v5  ;;  %1270 = vmatprep.subr.bf16.mxu0 %v3260_v33  ;;  %2374 = vmatprep.subr.bf16.mxu1 %v3666_v59 }
 0x564   :  { %2130 = vst.sshfl [vmem:[%s3654_s7 + $0x24] sm:$0x1 pattern:$0x73625140] %v1776_v22  ;;  %1300 = vmatprep.mubr.bf16.mxu0 %v3667_v6  ;;  %v1806_v0 = vrot.slane %v1778_v23, %v3001_v14  ;;  %v1808_v52 = vcombine.high %v1792_v63, %v1792_v63  ;;  %v1809_v27 = vcombine.high %v1799_v21, %v1799_v21  ;;  %1821 = vst [vmem:[%s3654_s7 + $0x14] sm:$0x1] %v1807_v26 }
 0x565   :  { %2131 = vst.sshfl [vmem:[%s3654_s7 + $0x2c] sm:$0x1 pattern:$0x73625140] %v1778_v23  ;;  %2388 = vmatprep.mubr.msk.bf16.mxu1 %vm2592_vm0, %v3666_v59  ;;  %1271 = vmatpush1.bf16.msra.mxu0 %v3277_v34 }
 0x566   :  { %2375 = vmatpush3.bf16.msra.mxu1 %v3384_v29  ;;  %v1810_v30 = vcombine.high %v1806_v0, %v1806_v0  ;;  %1822 = vst [vmem:[%s3654_s7 + $0x1c] sm:$0x1] %v1809_v27  ;;  %1825 = vst [vmem:[%s3654_s7 + $0x34] sm:$0x1] %v1808_v52  ;;  %1272 = vmatprep.subr.bf16.mxu0 %v3290_v2 }
 0x567   :  { %2376 = vmatprep.subr.bf16.mxu1 %v3666_v59 }
 0x568   :  { %1826 = vst [vmem:[%s3654_s7 + $0x3c] sm:$0x1] %v1810_v30 }
 0x569   :  { %1273 = vmatpush1.bf16.msra.mxu0 %v3300_v40 }
 0x56a   :  { %2377 = vmatpush3.bf16.msra.mxu1 %v3402_v32  ;;  %1274 = vmatprep.subr.bf16.mxu0 %v3307_v12 }
 0x56b   :  { %2378 = vmatprep.subr.bf16.mxu1 %v3666_v59 }
 0x56d   :  { %1275 = vmatpush1.bf16.msra.mxu0 %v3410_v35 }
 0x56e   :  { %2379 = vmatpush3.bf16.msra.mxu1 %v3416_v13  ;;  %1276 = vmatprep.subr.bf16.mxu0 %v3422_v58 }
 0x56f   :  { %2380 = vmatprep.subr.bf16.mxu1 %v3666_v59 }
 0x571   :  { %1277 = vmatpush1.bf16.msra.mxu0 %v3429_v10 }
 0x572   :  { %2381 = vmatpush3.bf16.msra.mxu1 %v3435_v39  ;;  %1278 = vmatprep.subr.bf16.mxu0 %v3441_v41 }
 0x573   :  { %2382 = vmatprep.subr.bf16.mxu1 %v3666_v59 }
 0x575   :  { %1279 = vmatpush1.bf16.msra.mxu0 %v3448_v42 }
 0x576   :  { %2383 = vmatpush3.bf16.msra.mxu1 %v3454_v43  ;;  %1280 = vmatprep.subr.bf16.mxu0 %v3460_v45 }
 0x577   :  { %2384 = vmatprep.subr.bf16.mxu1 %v3666_v59 }
 0x579   :  { %1281 = vmatpush1.bf16.msra.mxu0 %v3467_v46 }
 0x57a   :  { %2385 = vmatpush3.bf16.msra.mxu1 %v3473_v47  ;;  %1282 = vmatprep.subr.bf16.mxu0 %v3479_v48 }
 0x57b   :  { %2386 = vmatprep.subr.bf16.mxu1 %v3666_v59 }
 0x57d   :  { %1283 = vmatpush1.bf16.msra.mxu0 %v3486_v49 }
 0x57e   :  { %2387 = vmatpush3.bf16.msra.mxu1 %v3492_v50  ;;  %1383 = vmatprep.subr.bf16.mxu0 %v3332_v37 }
 0x57f   :  { %2392 = vmatprep.subr.bf16.mxu1 %v3666_v59 }
 0x633   :  { %v1187_v51 = vpop.f32.mrb[36].mxu0 }
 0x634   :  { %v1228_v53 = vpop.f32.mrb[28].mxu1  ;;  %v1234_v55 = vadd.f32 %v1187_v51, %v2965_v54  ;;  %v1189_v56 = vpop.f32.mrb[37].mxu0 }
 0x635   :  { %v2370_v20 = vpop.f32.mrb[29].mxu1  ;;  %v1241_v25 = vadd.f32 %v1189_v56, %v2970_v61  ;;  %v1191_v4 = vpop.f32.mrb[38].mxu0  ;;  %v1248_v19 = vadd.f32 %v2992_v62, %v1228_v53 }
 0x636   :  { %v1231_v28 = vpop.f32.mrb[30].mxu1  ;;  %v2106_v24 = vmul.f32 -1.442695, %v1234_v55  ;;  %v1192_v36 = vpop.f32.mrb[39].mxu0  ;;  %v3671_v20 = vld [vmem:[#allocation4_spill] sm:$0xff] }
 0x637   :  { %v2371_v11 = vpop.f32.mrb[31].mxu1  ;;  %v2107_v7 = vmul.f32 -1.442695, %v1241_v25 }
 0x638   :  { %2535 = vpow2.f32 %v2106_v24 }
 0x639   :  { %2537 = vpow2.f32 %v2107_v7 }
 0x642   :  { %v2536_v60 = vpop.eup %2535 }
 0x643   :  { %v1238_v37 = vadd.f32 1.0, %v2536_v60  ;;  %v2538_v15 = vpop.eup %2537 }
 0x644   :  { %v1245_v9 = vadd.f32 1.0, %v2538_v15 }
 0x645   :  { %2539 = vrcp.f32 %v1238_v37 }
 0x646   :  { %2541 = vrcp.f32 %v1245_v9 }
 0x64f   :  { %v2540_v54 = vpop.eup %2539 }
 0x650   :  { %v1249_v44 = vmul.f32 %v2540_v54, %v1248_v19  ;;  %v2542_v16 = vpop.eup %2541 }
 0x651   :  { %v1252_v3 = vsub.f32 1.0, %v2542_v16  ;;  %v1254_v5 = vmul.f32 %v2542_v16, %v3343_v18 }
 0x652   :  { %v1250_v61 = vadd.f32 %v1249_v44, %v3668_v17 }
 0x654   :  { %2543 = vtanh.f32 %v1250_v61 }
 0x65e   :  { %v2544_v22 = vpop.eup %2543 }
 0x65f   :  { %v1253_v31 = vmul.f32 %v2544_v22, %v1252_v3 }
 0x661   :  { %v1255_v23 = vadd.f32 %v1254_v5, %v1253_v31 }
 0x663   :  { %v1257_v63 = vsel %vm1256_vm6, %v1255_v23, 0.0  ;;  %v3504_v21 = vsel %vm1256_vm6, %v1255_v23, %v3343_v18 }
 0x664   :  { %v1267_v62 = vpack.c.bf16 %v3504_v21, %v3504_v21  ;;  %v1829_v26 = vcombine.high %v1257_v63, %v1257_v63  ;;  %v1836_v0 = vrot.slane %v1257_v63, %v3001_v14 }
 0x666   :  { %1301 = vmatmul.mubr.bf16.vlgmr.msra.gmra.mrb[40].mxu0 %v1267_v62  ;;  %v1843_v52 = vrot.slane %v1829_v26, %v3001_v14  ;;  %v1844_v27 = vcombine.high %v1836_v0, %v1836_v0  ;;  %v1852_v30 = vrot.slane %v1836_v0, %v3001_v14  ;;  %2132 = vst.sshfl [vmem:[%s3654_s7 + $0x5] sm:$0x1 pattern:$0x73625140] %v1836_v0  ;;  %v3672_v26 = vld [vmem:[#allocation9_spill] sm:$0xff] }
 0x667   :  { %2389 = vmatmul.mubr.bf16.vlgmr.msra.gmra.mrb[32].mxu1 %v1267_v62  ;;  %1384 = vmatpush1.bf16.msra.mxu0 %v3245_v8 }
 0x668   :  { %2393 = vmatpush3.bf16.msra.mxu1 %v3357_v1  ;;  %v1845_v18 = vcombine.high %v1843_v52, %v1843_v52  ;;  %v1859_v51 = vrot.slane %v1843_v52, %v3001_v14  ;;  %v1866_v53 = vrot.slane %v1844_v27, %v3001_v14  ;;  %v1874_v55 = vcombine.high %v1852_v30, %v1852_v30 }
 0x669   :  { %2133 = vst.sshfl [vmem:[%s3654_s7 + $0xd] sm:$0x1 pattern:$0x73625140] %v1844_v27  ;;  %1385 = vmatprep.subr.bf16.mxu0 %v3260_v33  ;;  %2394 = vmatprep.subr.bf16.mxu1 %v3666_v59 }
 0x66a   :  { %2134 = vst.sshfl [vmem:[%s3654_s7 + $0x25] sm:$0x1 pattern:$0x73625140] %v1843_v52  ;;  %1415 = vmatprep.mubr.bf16.mxu0 %v3667_v6  ;;  %v1873_v8 = vrot.slane %v1845_v18, %v3001_v14  ;;  %v1875_v1 = vcombine.high %v1859_v51, %v1859_v51  ;;  %v1876_v56 = vcombine.high %v1866_v53, %v1866_v53  ;;  %1888 = vst [vmem:[%s3654_s7 + $0x15] sm:$0x1] %v1874_v55 }
 0x66b   :  { %2135 = vst.sshfl [vmem:[%s3654_s7 + $0x2d] sm:$0x1 pattern:$0x73625140] %v1845_v18  ;;  %2408 = vmatprep.mubr.msk.bf16.mxu1 %vm2592_vm0, %v3666_v59  ;;  %1386 = vmatpush1.bf16.msra.mxu0 %v3277_v34 }
 0x66c   :  { %2395 = vmatpush3.bf16.msra.mxu1 %v3384_v29  ;;  %v1877_v6 = vcombine.high %v1873_v8, %v1873_v8  ;;  %1889 = vst [vmem:[%s3654_s7 + $0x1d] sm:$0x1] %v1876_v56  ;;  %1892 = vst [vmem:[%s3654_s7 + $0x35] sm:$0x1] %v1875_v1  ;;  %1387 = vmatprep.subr.bf16.mxu0 %v3290_v2  ;;  %v3669_v2 = vld [vmem:[#allocation7_spill] sm:$0xff] }
 0x66d   :  { %2396 = vmatprep.subr.bf16.mxu1 %v3666_v59 }
 0x66e   :  { %1893 = vst [vmem:[%s3654_s7 + $0x3d] sm:$0x1] %v1877_v6 }
 0x66f   :  { %1388 = vmatpush1.bf16.msra.mxu0 %v3300_v40 }
 0x670   :  { %2397 = vmatpush3.bf16.msra.mxu1 %v3402_v32  ;;  %1389 = vmatprep.subr.bf16.mxu0 %v3307_v12  ;;  %v3670_v32 = vld [vmem:[#allocation8_spill] sm:$0xff] }
 0x671   :  { %2398 = vmatprep.subr.bf16.mxu1 %v3666_v59 }
 0x673   :  { %1390 = vmatpush1.bf16.msra.mxu0 %v3410_v35 }
 0x674   :  { %2399 = vmatpush3.bf16.msra.mxu1 %v3416_v13  ;;  %1391 = vmatprep.subr.bf16.mxu0 %v3422_v58 }
 0x675   :  { %2400 = vmatprep.subr.bf16.mxu1 %v3666_v59 }
 0x677   :  { %1392 = vmatpush1.bf16.msra.mxu0 %v3429_v10 }
 0x678   :  { %2401 = vmatpush3.bf16.msra.mxu1 %v3435_v39  ;;  %1393 = vmatprep.subr.bf16.mxu0 %v3441_v41 }
 0x679   :  { %2402 = vmatprep.subr.bf16.mxu1 %v3666_v59 }
 0x67b   :  { %1394 = vmatpush1.bf16.msra.mxu0 %v3448_v42 }
 0x67c   :  { %2403 = vmatpush3.bf16.msra.mxu1 %v3454_v43  ;;  %1395 = vmatprep.subr.bf16.mxu0 %v3460_v45 }
 0x67d   :  { %2404 = vmatprep.subr.bf16.mxu1 %v3666_v59 }
 0x67f   :  { %1396 = vmatpush1.bf16.msra.mxu0 %v3467_v46 }
 0x680   :  { %2405 = vmatpush3.bf16.msra.mxu1 %v3473_v47  ;;  %1397 = vmatprep.subr.bf16.mxu0 %v3479_v48  ;;  %v2589_v47 = vld [vmem:[%s3653_s6] ss:$0 sm:$0xff] }
 0x681   :  { %2406 = vmatprep.subr.bf16.mxu1 %v3666_v59 }
 0x683   :  { %1398 = vmatpush1.bf16.msra.mxu0 %v3486_v49 }
 0x684   :  { %2407 = vmatpush3.bf16.msra.mxu1 %v3492_v50 }
 0x739   :  { %v1302_v33 = vpop.f32.mrb[40].mxu0 }
 0x73a   :  { %v1343_v34 = vpop.f32.mrb[32].mxu1  ;;  %v1349_v40 = vadd.f32 %v1302_v33, %v3669_v2  ;;  %v1304_v12 = vpop.f32.mrb[41].mxu0 }
 0x73b   :  { %v2390_v29 = vpop.f32.mrb[33].mxu1  ;;  %v1356_v35 = vadd.f32 %v1304_v12, %v3670_v32  ;;  %v1306_v13 = vpop.f32.mrb[42].mxu0  ;;  %v1363_v48 = vadd.f32 %v2589_v47, %v1343_v34 }
 0x73c   :  { %v1346_v58 = vpop.f32.mrb[34].mxu1  ;;  %v2108_v10 = vmul.f32 -1.442695, %v1349_v40  ;;  %v1307_v39 = vpop.f32.mrb[43].mxu0  ;;  %v3673_v29 = vld [vmem:[#allocation5_spill] sm:$0xff] }
 0x73d   :  { %v2391_v41 = vpop.f32.mrb[35].mxu1  ;;  %v2109_v42 = vmul.f32 -1.442695, %v1356_v35 }
 0x73e   :  { %2545 = vpow2.f32 %v2108_v10 }
 0x73f   :  { %2547 = vpow2.f32 %v2109_v42 }
 0x748   :  { %v2546_v59 = vpop.eup %2545 }
 0x749   :  { %v1353_v43 = vadd.f32 1.0, %v2546_v59  ;;  %v2548_v45 = vpop.eup %2547 }
 0x74a   :  { %v1360_v46 = vadd.f32 1.0, %v2548_v45 }
 0x74b   :  { %2549 = vrcp.f32 %v1353_v43 }
 0x74c   :  { %2551 = vrcp.f32 %v1360_v46 }
 0x755   :  { %v2550_v49 = vpop.eup %2549 }
 0x756   :  { %v1364_v50 = vmul.f32 %v2550_v49, %v1363_v48  ;;  %v2552_v4 = vpop.eup %2551 }
 0x757   :  { %v1367_v28 = vsub.f32 1.0, %v2552_v4  ;;  %v1369_v36 = vmul.f32 %v2552_v4, %v3504_v21 }
 0x758   :  { %v1365_v25 = vadd.f32 %v1364_v50, %v3671_v20 }
 0x75a   :  { %2553 = vtanh.f32 %v1365_v25 }
 0x764   :  { %v2554_v24 = vpop.eup %2553 }
 0x765   :  { %v1368_v11 = vmul.f32 %v2554_v24, %v1367_v28 }
 0x767   :  { %v1370_v7 = vadd.f32 %v1369_v36, %v1368_v11 }
 0x769   :  { %v1372_v60 = vsel %vm1371_vm7, %v1370_v7, 0.0  ;;  %v1375_v37 = vsel %vm1371_vm7, %v1370_v7, %v3504_v21 }
 0x76a   :  { %v1382_v15 = vpack.c.bf16 %v1375_v37, %v1375_v37  ;;  %v1896_v9 = vcombine.high %v1372_v60, %v1372_v60  ;;  %v1903_v19 = vrot.slane %v1372_v60, %v3001_v14 }
 0x76c   :  { %1416 = vmatmul.mubr.bf16.vlgmr.msra.gmra.mrb[44].mxu0 %v1382_v15  ;;  %v1910_v54 = vrot.slane %v1896_v9, %v3001_v14  ;;  %v1911_v44 = vcombine.high %v1903_v19, %v1903_v19  ;;  %v1919_v17 = vrot.slane %v1903_v19, %v3001_v14  ;;  %2136 = vst.sshfl [vmem:[%s3654_s7 + $0x6] sm:$0x1 pattern:$0x73625140] %v1903_v19 }
 0x76d   :  { %2409 = vmatmul.mubr.bf16.vlgmr.msra.gmra.mrb[36].mxu1 %v1382_v15 }
 0x76e   :  { %v1912_v61 = vcombine.high %v1910_v54, %v1910_v54  ;;  %v1926_v16 = vrot.slane %v1910_v54, %v3001_v14  ;;  %v1933_v3 = vrot.slane %v1911_v44, %v3001_v14  ;;  %v1941_v22 = vcombine.high %v1919_v17, %v1919_v17  ;;  %2137 = vst.sshfl [vmem:[%s3654_s7 + $0xe] sm:$0x1 pattern:$0x73625140] %v1911_v44 }
 0x76f   :  { %2138 = vst.sshfl [vmem:[%s3654_s7 + $0x26] sm:$0x1 pattern:$0x73625140] %v1910_v54 }
 0x770   :  { %v1940_v5 = vrot.slane %v1912_v61, %v3001_v14  ;;  %v1942_v31 = vcombine.high %v1926_v16, %v1926_v16  ;;  %v1943_v23 = vcombine.high %v1933_v3, %v1933_v3  ;;  %1955 = vst [vmem:[%s3654_s7 + $0x16] sm:$0x1] %v1941_v22  ;;  %2139 = vst.sshfl [vmem:[%s3654_s7 + $0x2e] sm:$0x1 pattern:$0x73625140] %v1912_v61 }
 0x772   :  { %v1944_v63 = vcombine.high %v1940_v5, %v1940_v5  ;;  %1956 = vst [vmem:[%s3654_s7 + $0x1e] sm:$0x1] %v1943_v23  ;;  %1959 = vst [vmem:[%s3654_s7 + $0x36] sm:$0x1] %v1942_v31 }
 0x774   :  { %1960 = vst [vmem:[%s3654_s7 + $0x3e] sm:$0x1] %v1944_v63 }
 0x83f   :  { %v1417_v21 = vpop.f32.mrb[44].mxu0 }
 0x840   :  { %v1458_v62 = vpop.f32.mrb[36].mxu1  ;;  %v1464_v0 = vadd.f32 %v1417_v21, %v3672_v26  ;;  %v1419_v52 = vpop.f32.mrb[45].mxu0 }
 0x841   :  { %v2410_v27 = vpop.f32.mrb[37].mxu1  ;;  %v1471_v30 = vadd.f32 %v1419_v52, %v2987_v38  ;;  %v1421_v18 = vpop.f32.mrb[46].mxu0  ;;  %v1478_v2 = vadd.f32 %v2589_v47, %v1458_v62 }
 0x842   :  { %v1461_v51 = vpop.f32.mrb[38].mxu1  ;;  %v2110_v53 = vmul.f32 -1.442695, %v1464_v0  ;;  %v1422_v55 = vpop.f32.mrb[47].mxu0 }
 0x843   :  { %v2411_v8 = vpop.f32.mrb[39].mxu1  ;;  %v2111_v1 = vmul.f32 -1.442695, %v1471_v30 }
 0x844   :  { %2555 = vpow2.f32 %v2110_v53 }
 0x845   :  { %2557 = vpow2.f32 %v2111_v1 }
 0x84e   :  { %v2556_v56 = vpop.eup %2555 }
 0x84f   :  { %v1468_v6 = vadd.f32 1.0, %v2556_v56  ;;  %v2558_v33 = vpop.eup %2557 }
 0x850   :  { %v1475_v34 = vadd.f32 1.0, %v2558_v33 }
 0x851   :  { %2559 = vrcp.f32 %v1468_v6 }
 0x852   :  { %2561 = vrcp.f32 %v1475_v34 }
 0x85b   :  { %v2560_v40 = vpop.eup %2559 }
 0x85c   :  { %v1479_v12 = vmul.f32 %v2560_v40, %v1478_v2  ;;  %v2562_v38 = vpop.eup %2561 }
 0x85d   :  { %v1482_v35 = vsub.f32 1.0, %v2562_v38  ;;  %v1484_v10 = vmul.f32 %v2562_v38, %v1375_v37 }
 0x85e   :  { %v1480_v32 = vadd.f32 %v1479_v12, %v3673_v29 }
 0x860   :  { %2563 = vtanh.f32 %v1480_v32 }
 0x86a   :  { %v2564_v13 = vpop.eup %2563 }
 0x86b   :  { %v1483_v58 = vmul.f32 %v2564_v13, %v1482_v35 }
 0x86d   :  { %v1485_v39 = vadd.f32 %v1484_v10, %v1483_v58 }
 0x86f   :  { %v1487_v41 = vsel %vm1486_vm8, %v1485_v39, 0.0  ;;  %v1490_v42 = vsel %vm1486_vm8, %v1485_v39, %v1375_v37 }
 0x870   :  { %1491 = vst [vmem:[%s3655_s8] sm:$0xff] %v1490_v42  ;;  %v1963_v59 = vcombine.high %v1487_v41, %v1487_v41  ;;  %v1970_v43 = vrot.slane %v1487_v41, %v3001_v14 }
 0x872   :  { %v1977_v45 = vrot.slane %v1963_v59, %v3001_v14  ;;  %v1978_v46 = vcombine.high %v1970_v43, %v1970_v43  ;;  %v1986_v47 = vrot.slane %v1970_v43, %v3001_v14  ;;  %2140 = vst.sshfl [vmem:[%s3654_s7 + $0x7] sm:$0x1 pattern:$0x73625140] %v1970_v43 }
 0x874   :  { %v1979_v48 = vcombine.high %v1977_v45, %v1977_v45  ;;  %v1993_v57 = vrot.slane %v1977_v45, %v3001_v14  ;;  %v2000_v49 = vrot.slane %v1978_v46, %v3001_v14  ;;  %v2008_v50 = vcombine.high %v1986_v47, %v1986_v47  ;;  %2141 = vst.sshfl [vmem:[%s3654_s7 + $0xf] sm:$0x1 pattern:$0x73625140] %v1978_v46 }
 0x875   :  { %2142 = vst.sshfl [vmem:[%s3654_s7 + $0x27] sm:$0x1 pattern:$0x73625140] %v1977_v45 }
 0x876   :  { %v2007_v20 = vrot.slane %v1979_v48, %v3001_v14  ;;  %v2009_v25 = vcombine.high %v1993_v57, %v1993_v57  ;;  %v2010_v4 = vcombine.high %v2000_v49, %v2000_v49  ;;  %2022 = vst [vmem:[%s3654_s7 + $0x17] sm:$0x1] %v2008_v50  ;;  %2143 = vst.sshfl [vmem:[%s3654_s7 + $0x2f] sm:$0x1 pattern:$0x73625140] %v1979_v48 }
 0x878   :  { %v2011_v28 = vcombine.high %v2007_v20, %v2007_v20  ;;  %2023 = vst [vmem:[%s3654_s7 + $0x1f] sm:$0x1] %v2010_v4  ;;  %2026 = vst [vmem:[%s3654_s7 + $0x37] sm:$0x1] %v2009_v25 }
 0x87a   :  { %2027 = vst [vmem:[%s3654_s7 + $0x3f] sm:$0x1] %v2011_v28 }

</bundles_post_ra>
